<compile_context>
chip_gen: v7x
topology: tpu7x:2x2x1
jax: 0.10.0
libtpu: 0.0.40
codegen_flags: <defaults>
</compile_context>

<pallas_src>
import numpy as np
import jax
import jax.numpy as jnp
from jax.experimental import pallas as pl
from jax.experimental.pallas import tpu as pltpu


def _round_up(x, m):
    return ((x + m - 1) // m) * m


def _conv_toeplitz(w, b, H, W, stride):
    """Dense-matmul (Toeplitz) form of a VALID, stride-`stride` 2D cross-correlation.

    w: (OC, IC, KH, KW) conv weight, b: (OC,) bias.
    Returns:
      K    : (H*W*IC, OH*OW*OC)  -- input/output flattened NHWC row-major
      bias : (OH*OW*OC,)         -- per-output-position bias, NHWC-flattened
    """
    OC, IC, KH, KW = w.shape
    OH = (H - KH) // stride + 1
    OW = (W - KW) // stride + 1
    K = np.zeros((H, W, IC, OH, OW, OC), dtype=np.float32)
    w_t = np.transpose(w, (2, 3, 1, 0))  # (KH, KW, IC, OC)
    for oh in range(OH):
        for ow in range(OW):
            for kh in range(KH):
                for kw in range(KW):
                    K[stride * oh + kh, stride * ow + kw, :, oh, ow, :] = w_t[kh, kw]
    K = K.reshape(H * W * IC, OH * OW * OC)
    bias = np.broadcast_to(b[None, None, :], (OH, OW, OC)).reshape(-1)
    return np.ascontiguousarray(K), np.ascontiguousarray(bias)


def build_params(w1, c1b, w2, c2b, wl, lb, H, W):
    """Host-side parameter setup: padded bf16 matmul weights + f32 bias rows."""
    w1 = np.asarray(w1, np.float32); c1b = np.asarray(c1b, np.float32)
    w2 = np.asarray(w2, np.float32); c2b = np.asarray(c2b, np.float32)
    wl = np.asarray(wl, np.float32); lb = np.asarray(lb, np.float32)

    OC1, IC1, KH, KW = w1.shape
    OC2 = w2.shape[0]
    stride = 2
    OH1 = (H - KH) // stride + 1
    OW1 = (W - KW) // stride + 1
    OH2 = (OH1 - KH) // stride + 1
    OW2 = (OW1 - KW) // stride + 1

    IN1 = H * W * IC1              # 289
    N1 = OH1 * OW1 * OC1           # 392
    N2 = OH2 * OW2 * OC2           # 128
    IN1_P = _round_up(IN1, 128)    # 384
    N1_P = _round_up(N1, 128)      # 512
    N2_P = _round_up(N2, 128)      # 128
    OUT_P = 128                    # lane-dense output width (real logits: 6)

    K1, b1 = _conv_toeplitz(w1, c1b, H, W, stride)        # (289, 392), (392,)
    K2, b2 = _conv_toeplitz(w2, c2b, OH1, OW1, stride)    # (392, 128), (128,)

    K1p = np.zeros((IN1_P, N1_P), np.float32); K1p[:IN1, :N1] = K1
    b1p = np.zeros((1, N1_P), np.float32);     b1p[0, :N1] = b1
    K2p = np.zeros((N1_P, N2_P), np.float32);  K2p[:N1, :N2] = K2
    b2p = np.zeros((1, N2_P), np.float32);     b2p[0, :N2] = b2

    # Linear weight: PyTorch flattens NCHW (oc, oh, ow); kernel's h2 is NHWC (oh, ow, oc).
    wl_nhwc = wl.reshape(6, OC2, OH2, OW2).transpose(0, 2, 3, 1).reshape(6, -1).T  # (128, 6)
    Wlp = np.zeros((N2_P, OUT_P), np.float32); Wlp[:N2, :6] = wl_nhwc
    blp = np.zeros((1, OUT_P), np.float32);    blp[0, :6] = lb

    return (
        jnp.asarray(K1p, jnp.bfloat16),
        jnp.asarray(b1p, jnp.float32),
        jnp.asarray(K2p, jnp.bfloat16),
        jnp.asarray(b2p, jnp.float32),
        jnp.asarray(Wlp, jnp.bfloat16),
        jnp.asarray(blp, jnp.float32),
    )


def secret_network_kernel(x_ref, k1_ref, b1_ref, k2_ref, b2_ref, wl_ref, bl_ref, o_ref):
    # conv1 as matmul + bias row + ReLU
    h1 = jnp.dot(x_ref[...], k1_ref[...], preferred_element_type=jnp.float32) + b1_ref[...]
    h1 = jnp.maximum(h1, 0.0).astype(jnp.bfloat16)
    # conv2 as matmul + bias row + ReLU
    h2 = jnp.dot(h1, k2_ref[...], preferred_element_type=jnp.float32) + b2_ref[...]
    h2 = jnp.maximum(h2, 0.0).astype(jnp.bfloat16)
    # final linear: lane-dense 128-wide output, real logits in columns 0..5
    o_ref[...] = (
        jnp.dot(h2, wl_ref[...], preferred_element_type=jnp.float32) + bl_ref[...]
    )


@jax.jit
def _forward_jit(x_nchw, k1, b1, k2, b2, wl, bl):
    B, C, H, W = x_nchw.shape
    IN = C * H * W
    IN_P = k1.shape[0]
    N1_P = k1.shape[1]
    N2_P = k2.shape[1]
    OUT_P = wl.shape[1]

    # Batch tile: multiple of 256 (fills v6e/v7x 256-row MXU; also multiple of 128 for
    # v5e), capped at 512 rows -> ~2.5 MiB VMEM working set incl. double buffers.
    TB = min(512, _round_up(B, 256))
    BP = _round_up(B, TB)
    n_tiles = BP // TB

    # NCHW flatten with C=1 equals the kernel's (h, w, c) flatten order.
    x_flat = x_nchw.reshape(B, IN).astype(jnp.bfloat16)
    x_pad = jnp.pad(x_flat, ((0, BP - B), (0, IN_P - IN)))

    flops = 2 * BP * (IN_P * N1_P + N1_P * N2_P + N2_P * OUT_P)
    bytes_accessed = (
        x_pad.size * 2 + k1.size * 2 + k2.size * 2 + wl.size * 2
        + (b1.size + b2.size + bl.size) * 4 + BP * OUT_P * 4
    )

    grid_spec = pltpu.PrefetchScalarGridSpec(
        num_scalar_prefetch=0,
        grid=(n_tiles,),
        in_specs=[
            # streamed activation tile
            pl.BlockSpec((TB, IN_P), lambda i: (i, 0)),
            # resident weights / biases (index_map -> block 0: DMA'd once, stay in VMEM)
            pl.BlockSpec((IN_P, N1_P), lambda i: (0, 0)),
            pl.BlockSpec((1, N1_P), lambda i: (0, 0)),
            pl.BlockSpec((N1_P, N2_P), lambda i: (0, 0)),
            pl.BlockSpec((1, N2_P), lambda i: (0, 0)),
            pl.BlockSpec((N2_P, OUT_P), lambda i: (0, 0)),
            pl.BlockSpec((1, OUT_P), lambda i: (0, 0)),
        ],
        out_specs=pl.BlockSpec((TB, OUT_P), lambda i: (i, 0)),
    )

    out = pl.pallas_call(
        secret_network_kernel,
        out_shape=jax.ShapeDtypeStruct((BP, OUT_P), jnp.float32),
        grid_spec=grid_spec,
        compiler_params=pltpu.CompilerParams(
            dimension_semantics=("parallel",),   # lets v7x's 2 TCs split the batch axis
            vmem_limit_bytes=32 << 20,           # sized for v7x (64 MiB phys / 32 MiB scoped)
        ),
        cost_estimate=pl.CostEstimate(
            flops=int(flops), transcendentals=0, bytes_accessed=int(bytes_accessed)
        ),
    )(x_pad, k1, b1, k2, b2, wl, bl)

    return out[:B, :6]


def secret_network_forward(x_nchw, params):
    """x_nchw: (B, 1, H, W) float32.  params: tuple from build_params."""
    return _forward_jit(x_nchw, *params)


def reference_forward(x_nchw, w1, c1b, w2, c2b, wl, lb):
    """Pure-JAX (f32) replica of the PyTorch forward (NCHW), for correctness checking."""
    dn1 = jax.lax.conv_dimension_numbers(x_nchw.shape, w1.shape, ("NCHW", "OIHW", "NCHW"))
    h = jax.lax.conv_general_dilated(x_nchw, w1, (2, 2), "VALID", dimension_numbers=dn1)
    h = jnp.maximum(h + c1b[None, :, None, None], 0.0)
    dn2 = jax.lax.conv_dimension_numbers(h.shape, w2.shape, ("NCHW", "OIHW", "NCHW"))
    h = jax.lax.conv_general_dilated(h, w2, (2, 2), "VALID", dimension_numbers=dn2)
    h = jnp.maximum(h + c2b[None, :, None, None], 0.0)
    h = h.reshape(h.shape[0], -1)  # PyTorch flattens NCHW: (oc, oh, ow)
    return h @ wl.T + lb


if __name__ == "__main__":
    # input_shape = (1, 17, 17)  -> conv1: 7x7x8 -> conv2: 2x2x32 -> n = 128
    H = W = 17
    B = 2
    KH = KW = 5
    OH2 = OW2 = ((H - KH) // 2 + 1 - KH) // 2 + 1  # 2
    n = 32 * OH2 * OW2                             # 128

    key = jax.random.PRNGKey(0)
    ks = jax.random.split(key, 7)
    # Deterministic synthetic parameters (shapes match the PyTorch module).
    w1 = (jax.random.uniform(ks[0], (8, 1, 5, 5), jnp.float32) - 0.5) * 0.4
    c1b = (jax.random.uniform(ks[1], (8,), jnp.float32) - 0.5) * 0.4
    w2 = (jax.random.uniform(ks[2], (32, 8, 5, 5), jnp.float32) - 0.5) * 0.2
    c2b = (jax.random.uniform(ks[3], (32,), jnp.float32) - 0.5) * 0.2
    wl = (jax.random.uniform(ks[4], (6, n), jnp.float32) - 0.5) * 0.2
    lb = (jax.random.uniform(ks[5], (6,), jnp.float32) - 0.5) * 0.2
    x = jax.random.uniform(ks[6], (B, 1, H, W), jnp.float32)

    params = build_params(w1, c1b, w2, c2b, wl, lb, H, W)

    out = secret_network_forward(x, params)
    out = jax.block_until_ready(out)

    ref = reference_forward(x, w1, c1b, w2, c2b, wl, lb)
    assert out.shape == (B, 6)
    # bf16 matmul operands with f32 accumulation -> looser tolerance than pure f32.
    np.testing.assert_allclose(np.asarray(out), np.asarray(ref), rtol=5e-2, atol=5e-2)
    print("KERNEL_OK")
</pallas_src>

<mosaic_0001>
module attributes {stable_mosaic.version = 11 : i64} {
  func.func @secret_network_kernel(%arg0: i32, %arg1: memref<256x384xbf16, #tpu.memory_space<vmem>>, %arg2: memref<384x512xbf16, #tpu.memory_space<vmem>>, %arg3: memref<1x512xf32, #tpu.memory_space<vmem>>, %arg4: memref<512x128xbf16, #tpu.memory_space<vmem>>, %arg5: memref<1x128xf32, #tpu.memory_space<vmem>>, %arg6: memref<128x128xbf16, #tpu.memory_space<vmem>>, %arg7: memref<1x128xf32, #tpu.memory_space<vmem>>, %arg8: memref<256x128xf32, #tpu.memory_space<vmem>>) attributes {dimension_semantics = [#tpu.dimension_semantics<parallel>], iteration_bounds = array<i64: 1>, scalar_prefetch = 0 : i64, scratch_operands = 0 : i64, tpu.core_type = #tpu.core_type<tc>, window_params = [{transform_indices = @transform_0, window_bounds = array<i64: 256, 384>}, {pipeline_mode = #tpu.pipeline_mode<synchronous>, transform_indices = @transform_1, window_bounds = array<i64: 384, 512>}, {pipeline_mode = #tpu.pipeline_mode<synchronous>, transform_indices = @transform_2, window_bounds = array<i64: 1, 512>}, {pipeline_mode = #tpu.pipeline_mode<synchronous>, transform_indices = @transform_3, window_bounds = array<i64: 512, 128>}, {pipeline_mode = #tpu.pipeline_mode<synchronous>, transform_indices = @transform_4, window_bounds = array<i64: 1, 128>}, {pipeline_mode = #tpu.pipeline_mode<synchronous>, transform_indices = @transform_5, window_bounds = array<i64: 128, 128>}, {pipeline_mode = #tpu.pipeline_mode<synchronous>, transform_indices = @transform_6, window_bounds = array<i64: 1, 128>}, {transform_indices = @transform_7, window_bounds = array<i64: 256, 128>}]} {
    %c0 = arith.constant 0 : index
    %c0_0 = arith.constant 0 : index
    %0 = vector.load %arg1[%c0, %c0_0] : memref<256x384xbf16, #tpu.memory_space<vmem>>, vector<256x384xbf16>
    %c0_1 = arith.constant 0 : index
    %c0_2 = arith.constant 0 : index
    %1 = vector.load %arg2[%c0_1, %c0_2] : memref<384x512xbf16, #tpu.memory_space<vmem>>, vector<384x512xbf16>
    %cst = arith.constant dense<0.000000e+00> : vector<256x512xf32>
    %2 = tpu.matmul %0, %1, %cst {dimension_numbers = #tpu.dot_dimension_numbers<[1], [0], [0], [1], [0, 0, 1, 1], [], []>} : vector<256x384xbf16>, vector<384x512xbf16>, vector<256x512xf32> -> vector<256x512xf32>
    %c0_3 = arith.constant 0 : index
    %c0_4 = arith.constant 0 : index
    %3 = vector.load %arg3[%c0_3, %c0_4] : memref<1x512xf32, #tpu.memory_space<vmem>>, vector<1x512xf32>
    %4 = vector.broadcast %3 : vector<1x512xf32> to vector<256x512xf32>
    %5 = arith.addf %2, %4 : vector<256x512xf32>
    %cst_5 = arith.constant 0.000000e+00 : f32
    %6 = vector.broadcast %cst_5 : f32 to vector<256x512xf32>
    %7 = arith.maximumf %5, %6 : vector<256x512xf32>
    %8 = arith.truncf %7 : vector<256x512xf32> to vector<256x512xbf16>
    %c0_6 = arith.constant 0 : index
    %c0_7 = arith.constant 0 : index
    %9 = vector.load %arg4[%c0_6, %c0_7] : memref<512x128xbf16, #tpu.memory_space<vmem>>, vector<512x128xbf16>
    %cst_8 = arith.constant dense<0.000000e+00> : vector<256x128xf32>
    %10 = tpu.matmul %8, %9, %cst_8 {dimension_numbers = #tpu.dot_dimension_numbers<[1], [0], [0], [1], [0, 0, 1, 1], [], []>} : vector<256x512xbf16>, vector<512x128xbf16>, vector<256x128xf32> -> vector<256x128xf32>
    %c0_9 = arith.constant 0 : index
    %c0_10 = arith.constant 0 : index
    %11 = vector.load %arg5[%c0_9, %c0_10] : memref<1x128xf32, #tpu.memory_space<vmem>>, vector<1x128xf32>
    %12 = vector.broadcast %11 : vector<1x128xf32> to vector<256x128xf32>
    %13 = arith.addf %10, %12 : vector<256x128xf32>
    %cst_11 = arith.constant 0.000000e+00 : f32
    %14 = vector.broadcast %cst_11 : f32 to vector<256x128xf32>
    %15 = arith.maximumf %13, %14 : vector<256x128xf32>
    %16 = arith.truncf %15 : vector<256x128xf32> to vector<256x128xbf16>
    %c0_12 = arith.constant 0 : index
    %c0_13 = arith.constant 0 : index
    %17 = vector.load %arg6[%c0_12, %c0_13] : memref<128x128xbf16, #tpu.memory_space<vmem>>, vector<128x128xbf16>
    %cst_14 = arith.constant dense<0.000000e+00> : vector<256x128xf32>
    %18 = tpu.matmul %16, %17, %cst_14 {dimension_numbers = #tpu.dot_dimension_numbers<[1], [0], [0], [1], [0, 0, 1, 1], [], []>} : vector<256x128xbf16>, vector<128x128xbf16>, vector<256x128xf32> -> vector<256x128xf32>
    %c0_15 = arith.constant 0 : index
    %c0_16 = arith.constant 0 : index
    %19 = vector.load %arg7[%c0_15, %c0_16] : memref<1x128xf32, #tpu.memory_space<vmem>>, vector<1x128xf32>
    %20 = vector.broadcast %19 : vector<1x128xf32> to vector<256x128xf32>
    %21 = arith.addf %18, %20 : vector<256x128xf32>
    %c0_17 = arith.constant 0 : index
    %c0_18 = arith.constant 0 : index
    %22 = vector.load %arg8[%c0_17, %c0_18] : memref<256x128xf32, #tpu.memory_space<vmem>>, vector<256x128xf32>
    tpu.vector_store %arg8[%c0_17, %c0_18], %21 {strides = array<i32>} : memref<256x128xf32, #tpu.memory_space<vmem>>, vector<256x128xf32>,
    return
  }
  func.func @transform_0(%arg0: i32) -> (i32, i32) {
    %c0_i32 = arith.constant 0 : i32
    %c0_i32_0 = arith.constant 0 : i32
    return %arg0, %c0_i32 : i32, i32
  }
  func.func @transform_1(%arg0: i32) -> (i32, i32) {
    %c0_i32 = arith.constant 0 : i32
    %c0_i32_0 = arith.constant 0 : i32
    %c0_i32_1 = arith.constant 0 : i32
    return %c0_i32, %c0_i32_0 : i32, i32
  }
  func.func @transform_2(%arg0: i32) -> (i32, i32) {
    %c0_i32 = arith.constant 0 : i32
    %c0_i32_0 = arith.constant 0 : i32
    %c0_i32_1 = arith.constant 0 : i32
    return %c0_i32, %c0_i32_0 : i32, i32
  }
  func.func @transform_3(%arg0: i32) -> (i32, i32) {
    %c0_i32 = arith.constant 0 : i32
    %c0_i32_0 = arith.constant 0 : i32
    %c0_i32_1 = arith.constant 0 : i32
    return %c0_i32, %c0_i32_0 : i32, i32
  }
  func.func @transform_4(%arg0: i32) -> (i32, i32) {
    %c0_i32 = arith.constant 0 : i32
    %c0_i32_0 = arith.constant 0 : i32
    %c0_i32_1 = arith.constant 0 : i32
    return %c0_i32, %c0_i32_0 : i32, i32
  }
  func.func @transform_5(%arg0: i32) -> (i32, i32) {
    %c0_i32 = arith.constant 0 : i32
    %c0_i32_0 = arith.constant 0 : i32
    %c0_i32_1 = arith.constant 0 : i32
    return %c0_i32, %c0_i32_0 : i32, i32
  }
  func.func @transform_6(%arg0: i32) -> (i32, i32) {
    %c0_i32 = arith.constant 0 : i32
    %c0_i32_0 = arith.constant 0 : i32
    %c0_i32_1 = arith.constant 0 : i32
    return %c0_i32, %c0_i32_0 : i32, i32
  }
  func.func @transform_7(%arg0: i32) -> (i32, i32) {
    %c0_i32 = arith.constant 0 : i32
    %c0_i32_0 = arith.constant 0 : i32
    return %arg0, %c0_i32 : i32, i32
  }
}

</mosaic_0001>

<bundles_post_ra>
// kernel: _forward_jit.1
= control target key start
LH: loop header
LB: loop body
LE: loop exit
PB: predicated region body
PF: predicated region fallthrough
CT: control target
= control target key end

     0   :  { %12 = vsyncpa [#allocation3], 0  ;;  %s3855_s24 = smov [#allocation2]   ;;  %s4708_s0 = inlined_call_operand.vmem [shape: bf16[256,384], index: 0, kind: input, shape index: {}]   ;;  %s4709_s1 = inlined_call_operand.hbm [shape: bf16[384,512], index: 1, kind: input, shape index: {}]   ;;  %s4710_s2 = inlined_call_operand.vmem [shape: f32[1,512], index: 2, kind: input, shape index: {}]   ;;  %s4711_s3 = inlined_call_operand.vmem [shape: bf16[512,128], index: 3, kind: input, shape index: {}]   ;;  %s4712_s4 = inlined_call_operand.vmem [shape: f32[1,128], index: 4, kind: input, shape index: {}]   ;;  %s4713_s5 = inlined_call_operand.vmem [shape: bf16[128,128], index: 5, kind: input, shape index: {}]   ;;  %s4714_s6 = inlined_call_operand.vmem [shape: f32[1,128], index: 6, kind: input, shape index: {}]   ;;  %s4715_s7 = inlined_call_operand.vmem [shape: f32[256,128], index: 7, kind: output, shape index: {}]  }
   0x1   :  { %s20_s25 = sshll.u32 %s3855_s24, 4  ;;  %s3831_s28 = scalar_lea.hbm %s4709_s1, 12288  ;;  %s21_s25 = int_to_ptr.vmem [resolvable:$true] %s20_s25 }
   0x2   :  { %p3832_p0 = scmp.ne.s32.totalorder %s4709_s1, %s3831_s28  ;;  %p3835_p1 = scmp.lt.u32.totalorder %s3831_s28, %s4709_s1 }
   0x4   :  { %p3837_p2 = pnand %p3835_p1, %p3832_p0 }
   0x6   :  { %3840 = shalt.err (!%p3837_p2)
}
   0x7   :  { %s3841_s10 = scalar_lea.vmem %s21_s25, 12288  ;;  %p3846_p4 = scmp.lt.s32.totalorder %s21_s25, %s21_s25 }
   0x8   :  { %p3842_p3 = scmp.ne.s32.totalorder %s21_s25, %s3841_s10  ;;  %p3847_p5 = scmp.lt.s32.totalorder %s3841_s10, %s3841_s10 }
   0xa   :  { %p3848_p6 = por %p3847_p5, %p3846_p4 }
   0xc   :  { %p3849_p7 = pnand %p3848_p6, %p3842_p3 }
   0xe   :  { %3852 = shalt.err (!%p3849_p7)
}
   0xf   :  { %s3856_s11 = smov 256   ;;  %s3857_s12 = smov 16  }
  0x10   :  { %26 = dma.hbm_to_vmem [thread:$0]  %s4709_s1, 12288, %s21_s25, [#allocation3], %s3856_s11, %s3856_s11, %s3857_s12  }
  0x11   :  { %3853 = dma.done.wait [#allocation3], 12288  }
  0x12   :  { %3854 = vsyncadd [#allocation3], 4294955008  ;;  %v3583_v0 = vld [vmem:[#allocation2 + $0x4] ss:$16 sps:$4 sm:$0xff]   ;;  %v3585_v1 = vld [vmem:[#allocation2 + $0xc] ss:$16 sps:$4 sm:$0xff]  }
  0x13   :  { %959 = vmatprep.subr.bf16.mxu0 %v3583_v0  ;;  %v3587_v2 = vld [vmem:[#allocation2] ss:$16 sps:$4 sm:$0xff]   ;;  %v3588_v3 = vld [vmem:[#allocation2 + $0x8] ss:$16 sps:$4 sm:$0xff]   ;;  %1345 = vmatprep.subr.bf16.mxu1 %v3585_v1  ;;  %v3589_v4 = vld [vmem:[#allocation2 + $0x24] ss:$16 sps:$4 sm:$0xff]  }
  0x14   :  { %960 = vmatpush1.bf16.msra.mxu0 %v3587_v2  ;;  %1346 = vmatpush1.bf16.msra.mxu1 %v3588_v3  ;;  %v3591_v5 = vld [vmem:[#allocation2 + $0x2c] ss:$16 sps:$4 sm:$0xff]   ;;  %v3593_v6 = vld [vmem:[#allocation2 + $0x20] ss:$16 sps:$4 sm:$0xff]   ;;  %v3594_v7 = vld [vmem:[#allocation2 + $0x28] ss:$16 sps:$4 sm:$0xff]  }
  0x15   :  { %961 = vmatprep.subr.bf16.mxu0 %v3589_v4  ;;  %1347 = vmatprep.subr.bf16.mxu1 %v3591_v5  ;;  %v3595_v8 = vld [vmem:[#allocation2 + $0x44] ss:$16 sps:$4 sm:$0xff]   ;;  %v3597_v9 = vld [vmem:[#allocation2 + $0x4c] ss:$16 sps:$4 sm:$0xff]   ;;  %v3599_v10 = vld [vmem:[#allocation2 + $0x40] ss:$16 sps:$4 sm:$0xff]  }
  0x16   :  { %v3600_v11 = vld [vmem:[#allocation2 + $0x48] ss:$16 sps:$4 sm:$0xff]   ;;  %v3601_v12 = vld [vmem:[#allocation2 + $0x64] ss:$16 sps:$4 sm:$0xff]   ;;  %v3603_v13 = vld [vmem:[#allocation2 + $0x6c] ss:$16 sps:$4 sm:$0xff]  }
  0x17   :  { %v3605_v14 = vld [vmem:[#allocation2 + $0x60] ss:$16 sps:$4 sm:$0xff]   ;;  %v3606_v15 = vld [vmem:[#allocation2 + $0x68] ss:$16 sps:$4 sm:$0xff]   ;;  %v3607_v16 = vld [vmem:[#allocation2 + $0x84] ss:$16 sps:$4 sm:$0xff]  }
  0x18   :  { %962 = vmatpush1.bf16.msra.mxu0 %v3593_v6  ;;  %1348 = vmatpush1.bf16.msra.mxu1 %v3594_v7  ;;  %v3609_v17 = vld [vmem:[#allocation2 + $0x8c] ss:$16 sps:$4 sm:$0xff]   ;;  %v3611_v18 = vld [vmem:[#allocation2 + $0x80] ss:$16 sps:$4 sm:$0xff]   ;;  %v3612_v19 = vld [vmem:[#allocation2 + $0x88] ss:$16 sps:$4 sm:$0xff]  }
  0x19   :  { %963 = vmatprep.subr.bf16.mxu0 %v3595_v8  ;;  %1349 = vmatprep.subr.bf16.mxu1 %v3597_v9  ;;  %v3613_v20 = vld [vmem:[#allocation2 + $0xa4] ss:$16 sps:$4 sm:$0xff]   ;;  %v3615_v21 = vld [vmem:[#allocation2 + $0xac] ss:$16 sps:$4 sm:$0xff]   ;;  %v3617_v22 = vld [vmem:[#allocation2 + $0xa0] ss:$16 sps:$4 sm:$0xff]  }
  0x1a   :  { %v3618_v23 = vld [vmem:[#allocation2 + $0xa8] ss:$16 sps:$4 sm:$0xff]   ;;  %v3619_v24 = vld [vmem:[#allocation2 + $0xc4] ss:$16 sps:$4 sm:$0xff]   ;;  %v3621_v25 = vld [vmem:[#allocation2 + $0xcc] ss:$16 sps:$4 sm:$0xff]  }
  0x1b   :  { %v3623_v26 = vld [vmem:[#allocation2 + $0xc0] ss:$16 sps:$4 sm:$0xff]   ;;  %v3624_v27 = vld [vmem:[#allocation2 + $0xc8] ss:$16 sps:$4 sm:$0xff]   ;;  %v3625_v28 = vld [vmem:[#allocation2 + $0xe4] ss:$16 sps:$4 sm:$0xff]  }
  0x1c   :  { %964 = vmatpush1.bf16.msra.mxu0 %v3599_v10  ;;  %1350 = vmatpush1.bf16.msra.mxu1 %v3600_v11  ;;  %v3627_v29 = vld [vmem:[#allocation2 + $0xec] ss:$16 sps:$4 sm:$0xff]   ;;  %v3629_v30 = vld [vmem:[#allocation2 + $0xe0] ss:$16 sps:$4 sm:$0xff]   ;;  %v3630_v31 = vld [vmem:[#allocation2 + $0xe8] ss:$16 sps:$4 sm:$0xff]  }
  0x1d   :  { %965 = vmatprep.subr.bf16.mxu0 %v3601_v12  ;;  %1351 = vmatprep.subr.bf16.mxu1 %v3603_v13  ;;  %v3631_v32 = vld [vmem:[#allocation2 + $0x104] ss:$16 sps:$4 sm:$0xff]   ;;  %v3633_v33 = vld [vmem:[#allocation2 + $0x10c] ss:$16 sps:$4 sm:$0xff]   ;;  %v3635_v34 = vld [vmem:[#allocation2 + $0x100] ss:$16 sps:$4 sm:$0xff]  }
  0x1e   :  { %v3636_v35 = vld [vmem:[#allocation2 + $0x108] ss:$16 sps:$4 sm:$0xff]   ;;  %v3637_v36 = vld [vmem:[#allocation2 + $0x124] ss:$16 sps:$4 sm:$0xff]   ;;  %v3639_v37 = vld [vmem:[#allocation2 + $0x12c] ss:$16 sps:$4 sm:$0xff]  }
  0x1f   :  { %v3641_v38 = vld [vmem:[#allocation2 + $0x120] ss:$16 sps:$4 sm:$0xff]   ;;  %v3642_v39 = vld [vmem:[#allocation2 + $0x128] ss:$16 sps:$4 sm:$0xff]   ;;  %v3643_v40 = vld [vmem:[#allocation2 + $0x144] ss:$16 sps:$4 sm:$0xff]  }
  0x20   :  { %966 = vmatpush1.bf16.msra.mxu0 %v3605_v14  ;;  %1352 = vmatpush1.bf16.msra.mxu1 %v3606_v15  ;;  %v3645_v41 = vld [vmem:[#allocation2 + $0x14c] ss:$16 sps:$4 sm:$0xff]   ;;  %v3647_v42 = vld [vmem:[#allocation2 + $0x140] ss:$16 sps:$4 sm:$0xff]   ;;  %v3648_v43 = vld [vmem:[#allocation2 + $0x148] ss:$16 sps:$4 sm:$0xff]  }
  0x21   :  { %967 = vmatprep.subr.bf16.mxu0 %v3607_v16  ;;  %1353 = vmatprep.subr.bf16.mxu1 %v3609_v17  ;;  %v3649_v44 = vld [vmem:[#allocation2 + $0x164] ss:$16 sps:$4 sm:$0xff]   ;;  %v3651_v45 = vld [vmem:[#allocation2 + $0x16c] ss:$16 sps:$4 sm:$0xff]   ;;  %v3653_v46 = vld [vmem:[#allocation2 + $0x160] ss:$16 sps:$4 sm:$0xff]  }
  0x22   :  { %v3654_v47 = vld [vmem:[#allocation2 + $0x168] ss:$16 sps:$4 sm:$0xff]   ;;  %v3681_v48 = vld [vmem:[%s4708_s0 + $0x4] ss:$12 sps:$4 sm:$0xff]   ;;  %v3657_v50 = vld [vmem:[#allocation2 + $0x18c] ss:$16 sps:$4 sm:$0xff]  }
  0x23   :  { %v3655_v49 = vld [vmem:[#allocation2 + $0x184] ss:$16 sps:$4 sm:$0xff]   ;;  %991 = vmatprep.mubr.bf16.mxu0 %v3681_v48  ;;  %1377 = vmatprep.mubr.bf16.mxu1 %v3681_v48  ;;  %v3659_v51 = vld [vmem:[#allocation2 + $0x180] ss:$16 sps:$4 sm:$0xff]   ;;  %v3660_v52 = vld [vmem:[#allocation2 + $0x188] ss:$16 sps:$4 sm:$0xff]  }
  0x24   :  { %968 = vmatpush1.bf16.msra.mxu0 %v3611_v18  ;;  %1354 = vmatpush1.bf16.msra.mxu1 %v3612_v19  ;;  %v3661_v53 = vld [vmem:[#allocation2 + $0x1a4] ss:$16 sps:$4 sm:$0xff]   ;;  %v3663_v54 = vld [vmem:[#allocation2 + $0x1ac] ss:$16 sps:$4 sm:$0xff]   ;;  %v3665_v55 = vld [vmem:[#allocation2 + $0x1a0] ss:$16 sps:$4 sm:$0xff]  }
  0x25   :  { %969 = vmatprep.subr.bf16.mxu0 %v3613_v20  ;;  %1355 = vmatprep.subr.bf16.mxu1 %v3615_v21  ;;  %v3666_v56 = vld [vmem:[#allocation2 + $0x1a8] ss:$16 sps:$4 sm:$0xff]   ;;  %v3667_v57 = vld [vmem:[#allocation2 + $0x1c4] ss:$16 sps:$4 sm:$0xff]   ;;  %v3669_v58 = vld [vmem:[#allocation2 + $0x1cc] ss:$16 sps:$4 sm:$0xff]  }
  0x26   :  { %v3671_v59 = vld [vmem:[#allocation2 + $0x1c0] ss:$16 sps:$4 sm:$0xff]   ;;  %v3672_v60 = vld [vmem:[#allocation2 + $0x1c8] ss:$16 sps:$4 sm:$0xff]   ;;  %v3673_v61 = vld [vmem:[#allocation2 + $0x1e4] ss:$16 sps:$4 sm:$0xff]  }
  0x27   :  { %v3675_v62 = vld [vmem:[#allocation2 + $0x1ec] ss:$16 sps:$4 sm:$0xff]   ;;  %v3677_v63 = vld [vmem:[#allocation2 + $0x1e0] ss:$16 sps:$4 sm:$0xff]   ;;  %v3678_v0 = vld [vmem:[#allocation2 + $0x1e8] ss:$16 sps:$4 sm:$0xff]  }
  0x28   :  { %970 = vmatpush1.bf16.msra.mxu0 %v3617_v22  ;;  %1356 = vmatpush1.bf16.msra.mxu1 %v3618_v23  ;;  %v3684_v1 = vld [vmem:[#allocation2 + $0x204] ss:$16 sps:$4 sm:$0xff]   ;;  %v3679_v2 = vld [vmem:[%s4708_s0] ss:$12 sps:$4 sm:$0xff]   ;;  %v3685_v4 = vld [vmem:[%s4708_s0 + $0x1c] ss:$12 sps:$4 sm:$0xff]  }
  0x29   :  { %971 = vmatprep.subr.bf16.mxu0 %v3619_v24  ;;  %1357 = vmatprep.subr.bf16.mxu1 %v3621_v25  ;;  %v3682_v3 = vld [vmem:[#allocation2 + $0x200] ss:$16 sps:$4 sm:$0xff]   ;;  %v3693_v5 = vld [vmem:[#allocation2 + $0x224] ss:$16 sps:$4 sm:$0xff]   ;;  %v3739_v9 = vld [vmem:[#allocation2 + $0x208] ss:$16 sps:$4 sm:$0xff]  }
  0x2a   :  { %v3691_v6 = vld [vmem:[#allocation2 + $0x220] ss:$16 sps:$4 sm:$0xff]   ;;  %v3687_v7 = vld [vmem:[%s4708_s0 + $0x18] ss:$12 sps:$4 sm:$0xff]   ;;  %v3741_v10 = vld [vmem:[#allocation2 + $0x20c] ss:$16 sps:$4 sm:$0xff]  }
  0x2b   :  { %v3702_v8 = vld [vmem:[#allocation2 + $0x244] ss:$16 sps:$4 sm:$0xff]   ;;  %v3744_v12 = vld [vmem:[#allocation2 + $0x22c] ss:$16 sps:$4 sm:$0xff]   ;;  %v3700_v13 = vld [vmem:[#allocation2 + $0x240] ss:$16 sps:$4 sm:$0xff]  }
  0x2c   :  { %972 = vmatpush1.bf16.msra.mxu0 %v3623_v26  ;;  %1358 = vmatpush1.bf16.msra.mxu1 %v3624_v27  ;;  %v3688_v11 = vld [vmem:[%s4708_s0 + $0x34] ss:$12 sps:$4 sm:$0xff]   ;;  %v3742_v14 = vld [vmem:[#allocation2 + $0x228] ss:$16 sps:$4 sm:$0xff]   ;;  %v3750_v16 = vld [vmem:[#allocation2 + $0x24c] ss:$16 sps:$4 sm:$0xff]  }
  0x2d   :  { %973 = vmatprep.subr.bf16.mxu0 %v3625_v28  ;;  %1359 = vmatprep.subr.bf16.mxu1 %v3627_v29  ;;  %v3711_v15 = vld [vmem:[#allocation2 + $0x264] ss:$16 sps:$4 sm:$0xff]   ;;  %v3709_v17 = vld [vmem:[#allocation2 + $0x260] ss:$16 sps:$4 sm:$0xff]   ;;  %v3748_v18 = vld [vmem:[#allocation2 + $0x248] ss:$16 sps:$4 sm:$0xff]  }
  0x2e   :  { %v3720_v19 = vld [vmem:[#allocation2 + $0x284] ss:$16 sps:$4 sm:$0xff]   ;;  %v3753_v20 = vld [vmem:[#allocation2 + $0x26c] ss:$16 sps:$4 sm:$0xff]   ;;  %v3718_v23 = vld [vmem:[#allocation2 + $0x280] ss:$16 sps:$4 sm:$0xff]  }
  0x2f   :  { %v3690_v21 = vld [vmem:[%s4708_s0 + $0x30] ss:$12 sps:$4 sm:$0xff]   ;;  %v3694_v22 = vld [vmem:[%s4708_s0 + $0x4c] ss:$12 sps:$4 sm:$0xff]   ;;  %v3729_v25 = vld [vmem:[#allocation2 + $0x2a4] ss:$16 sps:$4 sm:$0xff]  }
  0x30   :  { %974 = vmatpush1.bf16.msra.mxu0 %v3629_v30  ;;  %1360 = vmatpush1.bf16.msra.mxu1 %v3630_v31  ;;  %v3751_v24 = vld [vmem:[#allocation2 + $0x268] ss:$16 sps:$4 sm:$0xff]   ;;  %v3762_v26 = vld [vmem:[#allocation2 + $0x28c] ss:$16 sps:$4 sm:$0xff]   ;;  %v3727_v27 = vld [vmem:[#allocation2 + $0x2a0] ss:$16 sps:$4 sm:$0xff]  }
  0x31   :  { %975 = vmatprep.subr.bf16.mxu0 %v3631_v32  ;;  %1361 = vmatprep.subr.bf16.mxu1 %v3633_v33  ;;  %v3738_v28 = vld [vmem:[#allocation2 + $0x2c4] ss:$16 sps:$4 sm:$0xff]   ;;  %v3760_v30 = vld [vmem:[#allocation2 + $0x288] ss:$16 sps:$4 sm:$0xff]   ;;  %v3765_v32 = vld [vmem:[#allocation2 + $0x2ac] ss:$16 sps:$4 sm:$0xff]  }
  0x32   :  { %v3696_v29 = vld [vmem:[%s4708_s0 + $0x48] ss:$12 sps:$4 sm:$0xff]   ;;  %v3697_v31 = vld [vmem:[%s4708_s0 + $0x64] ss:$12 sps:$4 sm:$0xff]  }
  0x33   :  { %v3736_v33 = vld [vmem:[#allocation2 + $0x2c0] ss:$16 sps:$4 sm:$0xff]  }
  0x34   :  { %976 = vmatpush1.bf16.msra.mxu0 %v3635_v34  ;;  %1362 = vmatpush1.bf16.msra.mxu1 %v3636_v35  ;;  %v3759_v34 = vld [vmem:[#allocation2 + $0x2e4] ss:$16 sps:$4 sm:$0xff]   ;;  %v3763_v35 = vld [vmem:[#allocation2 + $0x2a8] ss:$16 sps:$4 sm:$0xff]  }
  0x35   :  { %977 = vmatprep.subr.bf16.mxu0 %v3637_v36  ;;  %1363 = vmatprep.subr.bf16.mxu1 %v3639_v37  ;;  %v3771_v36 = vld [vmem:[#allocation2 + $0x2cc] ss:$16 sps:$4 sm:$0xff]   ;;  %v3757_v37 = vld [vmem:[#allocation2 + $0x2e0] ss:$16 sps:$4 sm:$0xff]  }
  0x36   :  { %v3715_v48 = vld [vmem:[%s4708_s0 + $0xc4] ss:$12 sps:$4 sm:$0xff]  }
  0x38   :  { %978 = vmatpush1.bf16.msra.mxu0 %v3641_v38  ;;  %1364 = vmatpush1.bf16.msra.mxu1 %v3642_v39  ;;  %v3769_v38 = vld [vmem:[#allocation2 + $0x2c8] ss:$16 sps:$4 sm:$0xff]   ;;  %v3774_v39 = vld [vmem:[#allocation2 + $0x2ec] ss:$16 sps:$4 sm:$0xff]  }
  0x39   :  { %979 = vmatprep.subr.bf16.mxu0 %v3643_v40  ;;  %1365 = vmatprep.subr.bf16.mxu1 %v3645_v41  ;;  %v3699_v40 = vld [vmem:[%s4708_s0 + $0x60] ss:$12 sps:$4 sm:$0xff]   ;;  %v3703_v41 = vld [vmem:[%s4708_s0 + $0x7c] ss:$12 sps:$4 sm:$0xff]  }
  0x3c   :  { %980 = vmatpush1.bf16.msra.mxu0 %v3647_v42  ;;  %1366 = vmatpush1.bf16.msra.mxu1 %v3648_v43  ;;  %v3772_v42 = vld [vmem:[#allocation2 + $0x2e8] ss:$16 sps:$4 sm:$0xff]  }
  0x3d   :  { %981 = vmatprep.subr.bf16.mxu0 %v3649_v44  ;;  %1367 = vmatprep.subr.bf16.mxu1 %v3651_v45  ;;  %v3705_v43 = vld [vmem:[%s4708_s0 + $0x78] ss:$12 sps:$4 sm:$0xff]   ;;  %v3706_v44 = vld [vmem:[%s4708_s0 + $0x94] ss:$12 sps:$4 sm:$0xff]   ;;  %v3708_v45 = vld [vmem:[%s4708_s0 + $0x90] ss:$12 sps:$4 sm:$0xff]  }
  0x40   :  { %982 = vmatpush1.bf16.msra.mxu0 %v3653_v46  ;;  %1368 = vmatpush1.bf16.msra.mxu1 %v3654_v47  ;;  %v3712_v46 = vld [vmem:[%s4708_s0 + $0xac] ss:$12 sps:$4 sm:$0xff]   ;;  %v3714_v47 = vld [vmem:[%s4708_s0 + $0xa8] ss:$12 sps:$4 sm:$0xff]  }
  0x41   :  { %983 = vmatprep.subr.bf16.mxu0 %v3655_v49  ;;  %1369 = vmatprep.subr.bf16.mxu1 %v3657_v50  ;;  %v3717_v49 = vld [vmem:[%s4708_s0 + $0xc0] ss:$12 sps:$4 sm:$0xff]   ;;  %v3721_v50 = vld [vmem:[%s4708_s0 + $0xdc] ss:$12 sps:$4 sm:$0xff]  }
  0x44   :  { %984 = vmatpush1.bf16.msra.mxu0 %v3659_v51  ;;  %1370 = vmatpush1.bf16.msra.mxu1 %v3660_v52  ;;  %v3723_v51 = vld [vmem:[%s4708_s0 + $0xd8] ss:$12 sps:$4 sm:$0xff]   ;;  %v3724_v52 = vld [vmem:[%s4708_s0 + $0xf4] ss:$12 sps:$4 sm:$0xff]  }
  0x45   :  { %985 = vmatprep.subr.bf16.mxu0 %v3661_v53  ;;  %1371 = vmatprep.subr.bf16.mxu1 %v3663_v54  ;;  %v3726_v53 = vld [vmem:[%s4708_s0 + $0xf0] ss:$12 sps:$4 sm:$0xff]   ;;  %v3730_v54 = vld [vmem:[%s4708_s0 + $0x10c] ss:$12 sps:$4 sm:$0xff]  }
  0x48   :  { %986 = vmatpush1.bf16.msra.mxu0 %v3665_v55  ;;  %1372 = vmatpush1.bf16.msra.mxu1 %v3666_v56  ;;  %v3732_v55 = vld [vmem:[%s4708_s0 + $0x108] ss:$12 sps:$4 sm:$0xff]   ;;  %v3733_v56 = vld [vmem:[%s4708_s0 + $0x124] ss:$12 sps:$4 sm:$0xff]  }
  0x49   :  { %987 = vmatprep.subr.bf16.mxu0 %v3667_v57  ;;  %1373 = vmatprep.subr.bf16.mxu1 %v3669_v58  ;;  %v3735_v57 = vld [vmem:[%s4708_s0 + $0x120] ss:$12 sps:$4 sm:$0xff]   ;;  %v3745_v58 = vld [vmem:[%s4708_s0 + $0x13c] ss:$12 sps:$4 sm:$0xff]  }
  0x4c   :  { %988 = vmatpush1.bf16.msra.mxu0 %v3671_v59  ;;  %1374 = vmatpush1.bf16.msra.mxu1 %v3672_v60  ;;  %v3747_v59 = vld [vmem:[%s4708_s0 + $0x138] ss:$12 sps:$4 sm:$0xff]   ;;  %v3754_v60 = vld [vmem:[%s4708_s0 + $0x154] ss:$12 sps:$4 sm:$0xff]  }
  0x4d   :  { %989 = vmatprep.subr.bf16.mxu0 %v3673_v61  ;;  %1375 = vmatprep.subr.bf16.mxu1 %v3675_v62  ;;  %v3756_v61 = vld [vmem:[%s4708_s0 + $0x150] ss:$12 sps:$4 sm:$0xff]   ;;  %v3766_v62 = vld [vmem:[%s4708_s0 + $0x16c] ss:$12 sps:$4 sm:$0xff]  }
  0x50   :  { %990 = vmatpush1.bf16.msra.mxu0 %v3677_v63  ;;  %1376 = vmatpush1.bf16.msra.mxu1 %v3678_v0  ;;  %v3768_v63 = vld [vmem:[%s4708_s0 + $0x168] ss:$12 sps:$4 sm:$0xff]   ;;  %v3791_v0 = vld [vmem:[%s4711_s3 + $0x40] sm:$0xff]  }
  0x51   :  { %1152 = vmatprep.subr.bf16.mxu0 %v3684_v1  ;;  %1538 = vmatprep.subr.bf16.mxu1 %v3741_v10  ;;  %v3858_v1 = vmov 0   ;;  %v3798_v10 = vld [vmem:[%s4711_s3 + $0x18] sm:$0xff]  }
  0x53   :  { %992 = vmatmul.mubr.bf16.vlgmr.msra.gmra.mrb[0].mxu0 %v3679_v2  ;;  %1378 = vmatmul.mubr.bf16.vlgmr.msra.gmra.mrb[0].mxu1 %v3679_v2  ;;  %v3775_v2 = vld [vmem:[%s4708_s0 + $0x8] ss:$12 sps:$4 sm:$0xff]  }
  0x54   :  { %1153 = vmatpush1.bf16.msra.mxu0 %v3682_v3  ;;  %1001 = vmatprep.mubr.bf16.mxu0 %v3685_v4  ;;  %v3792_v3 = vld [vmem:[%s4711_s3] sm:$0xff]  }
  0x55   :  { %1387 = vmatprep.mubr.bf16.mxu1 %v3685_v4  ;;  %1154 = vmatprep.subr.bf16.mxu0 %v3693_v5  ;;  %v3793_v4 = vld [vmem:[%s4711_s3 + $0x48] sm:$0xff]  }
  0x56   :  { %1539 = vmatpush1.bf16.msra.mxu1 %v3739_v9  ;;  %v3794_v5 = vld [vmem:[%s4711_s3 + $0x8] sm:$0xff]   ;;  %v3797_v9 = vld [vmem:[%s4711_s3 + $0x58] sm:$0xff]  }
  0x57   :  { %1540 = vmatprep.subr.bf16.mxu1 %v3744_v12  ;;  %v3777_v12 = vld [vmem:[%s4708_s0 + $0x38] ss:$12 sps:$4 sm:$0xff]  }
  0x58   :  { %1155 = vmatpush1.bf16.msra.mxu0 %v3691_v6  ;;  %v3795_v6 = vld [vmem:[%s4711_s3 + $0x50] sm:$0xff]  }
  0x59   :  { %1156 = vmatprep.subr.bf16.mxu0 %v3702_v8  ;;  %v3796_v8 = vld [vmem:[%s4711_s3 + $0x10] sm:$0xff]  }
  0x5a   :  { %1541 = vmatpush1.bf16.msra.mxu1 %v3742_v14  ;;  %v3801_v14 = vld [vmem:[%s4711_s3 + $0x68] sm:$0xff]  }
  0x5b   :  { %1002 = vmatmul.mubr.bf16.gmra.mrb[4].mxu0 %v3687_v7  ;;  %1388 = vmatmul.mubr.bf16.gmra.mrb[4].mxu1 %v3687_v7  ;;  %v3776_v7 = vld [vmem:[%s4708_s0 + $0x20] ss:$12 sps:$4 sm:$0xff]  }
  0x5c   :  { %1011 = vmatprep.mubr.bf16.mxu0 %v3688_v11  ;;  %1397 = vmatprep.mubr.bf16.mxu1 %v3688_v11  ;;  %v3799_v11 = vld [vmem:[%s4711_s3 + $0x60] sm:$0xff]  }
  0x5d   :  { %1157 = vmatpush1.bf16.msra.mxu0 %v3700_v13  ;;  %1542 = vmatprep.subr.bf16.mxu1 %v3750_v16  ;;  %v3800_v13 = vld [vmem:[%s4711_s3 + $0x20] sm:$0xff]   ;;  %v3779_v16 = vld [vmem:[%s4708_s0 + $0x68] ss:$12 sps:$4 sm:$0xff]  }
  0x5e   :  { %1158 = vmatprep.subr.bf16.mxu0 %v3711_v15  ;;  %1543 = vmatpush1.bf16.msra.mxu1 %v3748_v18  ;;  %v3778_v15 = vld [vmem:[%s4708_s0 + $0x50] ss:$12 sps:$4 sm:$0xff]   ;;  %v3781_v18 = vld [vmem:[%s4708_s0 + $0x98] ss:$12 sps:$4 sm:$0xff]  }
  0x5f   :  { %1544 = vmatprep.subr.bf16.mxu1 %v3753_v20  ;;  %v3783_v20 = vld [vmem:[%s4708_s0 + $0xc8] ss:$12 sps:$4 sm:$0xff]  }
  0x61   :  { %1159 = vmatpush1.bf16.msra.mxu0 %v3709_v17  ;;  %v3780_v17 = vld [vmem:[%s4708_s0 + $0x80] ss:$12 sps:$4 sm:$0xff]  }
  0x62   :  { %1160 = vmatprep.subr.bf16.mxu0 %v3720_v19  ;;  %1545 = vmatpush1.bf16.msra.mxu1 %v3751_v24  ;;  %v3782_v19 = vld [vmem:[%s4708_s0 + $0xb0] ss:$12 sps:$4 sm:$0xff]  }
  0x63   :  { %1012 = vmatmul.mubr.bf16.gmra.mrb[8].mxu0 %v3690_v21  ;;  %1398 = vmatmul.mubr.bf16.gmra.mrb[8].mxu1 %v3690_v21  ;;  %v3784_v21 = vld [vmem:[%s4708_s0 + $0xe0] ss:$12 sps:$4 sm:$0xff]   ;;  %v3786_v24 = vld [vmem:[%s4708_s0 + $0x110] ss:$12 sps:$4 sm:$0xff]  }
  0x64   :  { %1021 = vmatprep.mubr.bf16.mxu0 %v3694_v22  ;;  %1407 = vmatprep.mubr.bf16.mxu1 %v3694_v22  ;;  %v3785_v22 = vld [vmem:[%s4708_s0 + $0xf8] ss:$12 sps:$4 sm:$0xff]  }
  0x65   :  { %1161 = vmatpush1.bf16.msra.mxu0 %v3718_v23  ;;  %1546 = vmatprep.subr.bf16.mxu1 %v3762_v26  ;;  %v3802_v23 = vld [vmem:[%s4711_s3 + $0x28] sm:$0xff]   ;;  %v3804_v26 = vld [vmem:[%s4711_s3 + $0x30] sm:$0xff]  }
  0x66   :  { %1162 = vmatprep.subr.bf16.mxu0 %v3729_v25  ;;  %1547 = vmatpush1.bf16.msra.mxu1 %v3760_v30  ;;  %v3803_v25 = vld [vmem:[%s4711_s3 + $0x70] sm:$0xff]   ;;  %v3788_v30 = vld [vmem:[%s4708_s0 + $0x140] ss:$12 sps:$4 sm:$0xff]  }
  0x67   :  { %1548 = vmatprep.subr.bf16.mxu1 %v3765_v32  ;;  %v3790_v32 = vld [vmem:[%s4708_s0 + $0x170] ss:$12 sps:$4 sm:$0xff]  }
  0x69   :  { %1163 = vmatpush1.bf16.msra.mxu0 %v3727_v27  ;;  %v3805_v27 = vld [vmem:[%s4711_s3 + $0x78] sm:$0xff]  }
  0x6a   :  { %1164 = vmatprep.subr.bf16.mxu0 %v3738_v28  ;;  %1549 = vmatpush1.bf16.msra.mxu1 %v3763_v35  ;;  %v3806_v28 = vld [vmem:[%s4711_s3 + $0x38] sm:$0xff]  }
  0x6b   :  { %1022 = vmatmul.mubr.bf16.gmra.mrb[12].mxu0 %v3696_v29  ;;  %1408 = vmatmul.mubr.bf16.gmra.mrb[12].mxu1 %v3696_v29  ;;  %v3787_v29 = vld [vmem:[%s4708_s0 + $0x128] ss:$12 sps:$4 sm:$0xff]  }
  0x6c   :  { %1031 = vmatprep.mubr.bf16.mxu0 %v3697_v31  ;;  %1417 = vmatprep.mubr.bf16.mxu1 %v3697_v31  ;;  %v3789_v31 = vld [vmem:[%s4708_s0 + $0x158] ss:$12 sps:$4 sm:$0xff]  }
  0x6d   :  { %1165 = vmatpush1.bf16.msra.mxu0 %v3736_v33  ;;  %1550 = vmatprep.subr.bf16.mxu1 %v3771_v36  ;;  %v3807_v33 = vld [vmem:[%s4711_s3 + $0xc0] sm:$0xff]  }
  0x6e   :  { %1166 = vmatprep.subr.bf16.mxu0 %v3759_v34  ;;  %1551 = vmatpush1.bf16.msra.mxu1 %v3769_v38  ;;  %v203_v34 = vlaneseq  ;;  %v201_v38 = vld [vmem:[%s4710_s2] sm:$0xf] }
  0x6f   :  { %1552 = vmatprep.subr.bf16.mxu1 %v3774_v39 }
  0x70   :  { %v204_v35 = vshrl.u32 %v203_v34, 7 }
  0x71   :  { %1167 = vmatpush1.bf16.msra.mxu0 %v3757_v37 }
  0x72   :  { %1553 = vmatpush1.bf16.msra.mxu1 %v3772_v42  ;;  %3011 = vmatprep.subr.bf16.mxu0 %v3791_v0  ;;  %v205_v36 = vsub.s32 0, %v204_v35  ;;  %v213_v37 = vsub.s32 2, %v204_v35  ;;  %v209_v39 = vsub.s32 1, %v204_v35 }
  0x73   :  { %1032 = vmatmul.mubr.bf16.gmra.mrb[16].mxu0 %v3699_v40  ;;  %1418 = vmatmul.mubr.bf16.gmra.mrb[16].mxu1 %v3699_v40  ;;  %v217_v40 = vsub.s32 3, %v204_v35 }
  0x74   :  { %1041 = vmatprep.mubr.bf16.mxu0 %v3703_v41  ;;  %1427 = vmatprep.mubr.bf16.mxu1 %v3703_v41  ;;  %v4141_v41 = vrot.slane %v201_v38, %v205_v36  ;;  %v4143_v42 = vrot.slane %v201_v38, %v213_v37 }
  0x75   :  { %3307 = vmatprep.subr.bf16.mxu1 %v3791_v0 }
  0x7b   :  { %1042 = vmatmul.mubr.bf16.gmra.mrb[20].mxu0 %v3705_v43  ;;  %1428 = vmatmul.mubr.bf16.gmra.mrb[20].mxu1 %v3705_v43  ;;  %v4145_v43 = vrot.slane %v201_v38, %v209_v39 }
  0x7c   :  { %1051 = vmatprep.mubr.bf16.mxu0 %v3706_v44  ;;  %1437 = vmatprep.mubr.bf16.mxu1 %v3706_v44  ;;  %v4147_v44 = vrot.slane %v201_v38, %v217_v40 }
  0x83   :  { %1052 = vmatmul.mubr.bf16.gmra.mrb[24].mxu0 %v3708_v45  ;;  %1438 = vmatmul.mubr.bf16.gmra.mrb[24].mxu1 %v3708_v45 }
  0x84   :  { %1061 = vmatprep.mubr.bf16.mxu0 %v3712_v46  ;;  %1447 = vmatprep.mubr.bf16.mxu1 %v3712_v46 }
  0x8b   :  { %1062 = vmatmul.mubr.bf16.gmra.mrb[28].mxu0 %v3714_v47  ;;  %1448 = vmatmul.mubr.bf16.gmra.mrb[28].mxu1 %v3714_v47 }
  0x8c   :  { %1071 = vmatprep.mubr.bf16.mxu0 %v3715_v48  ;;  %1457 = vmatprep.mubr.bf16.mxu1 %v3715_v48 }
  0x93   :  { %1072 = vmatmul.mubr.bf16.gmra.mrb[32].mxu0 %v3717_v49  ;;  %1458 = vmatmul.mubr.bf16.gmra.mrb[32].mxu1 %v3717_v49 }
  0x94   :  { %1081 = vmatprep.mubr.bf16.mxu0 %v3721_v50  ;;  %1467 = vmatprep.mubr.bf16.mxu1 %v3721_v50 }
  0x9b   :  { %1082 = vmatmul.mubr.bf16.gmra.mrb[36].mxu0 %v3723_v51  ;;  %1468 = vmatmul.mubr.bf16.gmra.mrb[36].mxu1 %v3723_v51 }
  0x9c   :  { %1091 = vmatprep.mubr.bf16.mxu0 %v3724_v52  ;;  %1477 = vmatprep.mubr.bf16.mxu1 %v3724_v52 }
  0xa3   :  { %1092 = vmatmul.mubr.bf16.gmra.mrb[40].mxu0 %v3726_v53  ;;  %1478 = vmatmul.mubr.bf16.gmra.mrb[40].mxu1 %v3726_v53 }
  0xa4   :  { %1101 = vmatprep.mubr.bf16.mxu0 %v3730_v54  ;;  %1487 = vmatprep.mubr.bf16.mxu1 %v3730_v54 }
  0xab   :  { %1102 = vmatmul.mubr.bf16.gmra.mrb[44].mxu0 %v3732_v55  ;;  %1488 = vmatmul.mubr.bf16.gmra.mrb[44].mxu1 %v3732_v55 }
  0xac   :  { %1111 = vmatprep.mubr.bf16.mxu0 %v3733_v56  ;;  %1497 = vmatprep.mubr.bf16.mxu1 %v3733_v56 }
  0xb3   :  { %1112 = vmatmul.mubr.bf16.gmra.mrb[48].mxu0 %v3735_v57  ;;  %1498 = vmatmul.mubr.bf16.gmra.mrb[48].mxu1 %v3735_v57 }
  0xb4   :  { %1121 = vmatprep.mubr.bf16.mxu0 %v3745_v58  ;;  %1507 = vmatprep.mubr.bf16.mxu1 %v3745_v58 }
  0xbb   :  { %1122 = vmatmul.mubr.bf16.gmra.mrb[52].mxu0 %v3747_v59  ;;  %1508 = vmatmul.mubr.bf16.gmra.mrb[52].mxu1 %v3747_v59 }
  0xbc   :  { %1131 = vmatprep.mubr.bf16.mxu0 %v3754_v60  ;;  %1517 = vmatprep.mubr.bf16.mxu1 %v3754_v60 }
  0xc3   :  { %1132 = vmatmul.mubr.bf16.gmra.mrb[56].mxu0 %v3756_v61  ;;  %1518 = vmatmul.mubr.bf16.gmra.mrb[56].mxu1 %v3756_v61 }
  0xc4   :  { %1141 = vmatprep.mubr.bf16.mxu0 %v3766_v62  ;;  %1527 = vmatprep.mubr.bf16.mxu1 %v3766_v62 }
  0xcb   :  { %1142 = vmatmul.mubr.bf16.gmra.mrb[60].mxu0 %v3768_v63  ;;  %1528 = vmatmul.mubr.bf16.gmra.mrb[60].mxu1 %v3768_v63 }
  0xcc   :  { %1184 = vmatprep.mubr.bf16.mxu0 %v3858_v1  ;;  %1570 = vmatprep.mubr.bf16.mxu1 %v3858_v1 }
  0xd3   :  { %1185 = vmatmul.mubr.bf16.vlgmr.msra.gmra.mrb[0].mxu0 %v3775_v2  ;;  %1571 = vmatmul.mubr.bf16.vlgmr.msra.gmra.mrb[0].mxu1 %v3775_v2 }
  0xd4   :  { %1194 = vmatprep.mubr.bf16.mxu0 %v3858_v1  ;;  %1580 = vmatprep.mubr.bf16.mxu1 %v3858_v1 }
  0xd5   :  { %3012 = vmatpush3.bf16.msra.mxu0 %v3792_v3  ;;  %3315 = vmatpush3.bf16.msra.mxu1 %v3792_v3 }
  0xd6   :  { %3013 = vmatprep.subr.bf16.mxu0 %v3793_v4  ;;  %3308 = vmatprep.subr.bf16.mxu1 %v3793_v4 }
  0xd9   :  { %3014 = vmatpush3.bf16.msra.mxu0 %v3794_v5  ;;  %3316 = vmatpush3.bf16.msra.mxu1 %v3794_v5 }
  0xda   :  { %3015 = vmatprep.subr.bf16.mxu0 %v3795_v6  ;;  %3309 = vmatprep.subr.bf16.mxu1 %v3795_v6 }
  0xdb   :  { %1195 = vmatmul.mubr.bf16.gmra.mrb[4].mxu0 %v3776_v7  ;;  %1581 = vmatmul.mubr.bf16.gmra.mrb[4].mxu1 %v3776_v7 }
  0xdc   :  { %1204 = vmatprep.mubr.bf16.mxu0 %v3858_v1  ;;  %1590 = vmatprep.mubr.bf16.mxu1 %v3858_v1 }
  0xdd   :  { %3016 = vmatpush3.bf16.msra.mxu0 %v3796_v8  ;;  %3317 = vmatpush3.bf16.msra.mxu1 %v3796_v8 }
  0xde   :  { %3017 = vmatprep.subr.bf16.mxu0 %v3797_v9  ;;  %3310 = vmatprep.subr.bf16.mxu1 %v3797_v9 }
  0xe1   :  { %3018 = vmatpush3.bf16.msra.mxu0 %v3798_v10  ;;  %3318 = vmatpush3.bf16.msra.mxu1 %v3798_v10 }
  0xe2   :  { %3019 = vmatprep.subr.bf16.mxu0 %v3799_v11  ;;  %3311 = vmatprep.subr.bf16.mxu1 %v3799_v11 }
  0xe3   :  { %1205 = vmatmul.mubr.bf16.gmra.mrb[8].mxu0 %v3777_v12  ;;  %1591 = vmatmul.mubr.bf16.gmra.mrb[8].mxu1 %v3777_v12 }
  0xe4   :  { %1214 = vmatprep.mubr.bf16.mxu0 %v3858_v1  ;;  %1600 = vmatprep.mubr.bf16.mxu1 %v3858_v1 }
  0xe5   :  { %3020 = vmatpush3.bf16.msra.mxu0 %v3800_v13  ;;  %3319 = vmatpush3.bf16.msra.mxu1 %v3800_v13 }
  0xe6   :  { %3021 = vmatprep.subr.bf16.mxu0 %v3801_v14  ;;  %3312 = vmatprep.subr.bf16.mxu1 %v3801_v14 }
  0xe9   :  { %3022 = vmatpush3.bf16.msra.mxu0 %v3802_v23  ;;  %3320 = vmatpush3.bf16.msra.mxu1 %v3802_v23 }
  0xea   :  { %3023 = vmatprep.subr.bf16.mxu0 %v3803_v25  ;;  %3313 = vmatprep.subr.bf16.mxu1 %v3803_v25 }
  0xeb   :  { %1215 = vmatmul.mubr.bf16.gmra.mrb[12].mxu0 %v3778_v15  ;;  %1601 = vmatmul.mubr.bf16.gmra.mrb[12].mxu1 %v3778_v15 }
  0xec   :  { %1224 = vmatprep.mubr.bf16.mxu0 %v3858_v1  ;;  %1610 = vmatprep.mubr.bf16.mxu1 %v3858_v1 }
  0xed   :  { %3024 = vmatpush3.bf16.msra.mxu0 %v3804_v26  ;;  %3321 = vmatpush3.bf16.msra.mxu1 %v3804_v26 }
  0xee   :  { %3025 = vmatprep.subr.bf16.mxu0 %v3805_v27  ;;  %3314 = vmatprep.subr.bf16.mxu1 %v3805_v27 }
  0xf1   :  { %3026 = vmatpush3.bf16.msra.mxu0 %v3806_v28  ;;  %3322 = vmatpush3.bf16.msra.mxu1 %v3806_v28 }
  0xf2   :  { %3123 = vmatprep.subr.bf16.mxu1 %v3807_v33 }
  0xf3   :  { %1225 = vmatmul.mubr.bf16.gmra.mrb[16].mxu0 %v3779_v16  ;;  %1611 = vmatmul.mubr.bf16.gmra.mrb[16].mxu1 %v3779_v16 }
  0xf4   :  { %1234 = vmatprep.mubr.bf16.mxu0 %v3858_v1  ;;  %1620 = vmatprep.mubr.bf16.mxu1 %v3858_v1 }
  0xfb   :  { %1235 = vmatmul.mubr.bf16.gmra.mrb[20].mxu0 %v3780_v17  ;;  %1621 = vmatmul.mubr.bf16.gmra.mrb[20].mxu1 %v3780_v17 }
  0xfc   :  { %1244 = vmatprep.mubr.bf16.mxu0 %v3858_v1  ;;  %1630 = vmatprep.mubr.bf16.mxu1 %v3858_v1 }
 0x103   :  { %1245 = vmatmul.mubr.bf16.gmra.mrb[24].mxu0 %v3781_v18  ;;  %1631 = vmatmul.mubr.bf16.gmra.mrb[24].mxu1 %v3781_v18 }
 0x104   :  { %1254 = vmatprep.mubr.bf16.mxu0 %v3858_v1  ;;  %1640 = vmatprep.mubr.bf16.mxu1 %v3858_v1 }
 0x10b   :  { %1255 = vmatmul.mubr.bf16.gmra.mrb[28].mxu0 %v3782_v19  ;;  %1641 = vmatmul.mubr.bf16.gmra.mrb[28].mxu1 %v3782_v19 }
 0x10c   :  { %1264 = vmatprep.mubr.bf16.mxu0 %v3858_v1  ;;  %1650 = vmatprep.mubr.bf16.mxu1 %v3858_v1 }
 0x113   :  { %1265 = vmatmul.mubr.bf16.gmra.mrb[32].mxu0 %v3783_v20  ;;  %1651 = vmatmul.mubr.bf16.gmra.mrb[32].mxu1 %v3783_v20 }
 0x114   :  { %1274 = vmatprep.mubr.bf16.mxu0 %v3858_v1  ;;  %1660 = vmatprep.mubr.bf16.mxu1 %v3858_v1 }
 0x11b   :  { %1275 = vmatmul.mubr.bf16.gmra.mrb[36].mxu0 %v3784_v21  ;;  %1661 = vmatmul.mubr.bf16.gmra.mrb[36].mxu1 %v3784_v21 }
 0x11c   :  { %1284 = vmatprep.mubr.bf16.mxu0 %v3858_v1  ;;  %1670 = vmatprep.mubr.bf16.mxu1 %v3858_v1 }
 0x123   :  { %1285 = vmatmul.mubr.bf16.gmra.mrb[40].mxu0 %v3785_v22  ;;  %1671 = vmatmul.mubr.bf16.gmra.mrb[40].mxu1 %v3785_v22 }
 0x124   :  { %1294 = vmatprep.mubr.bf16.mxu0 %v3858_v1  ;;  %1680 = vmatprep.mubr.bf16.mxu1 %v3858_v1 }
 0x12b   :  { %1295 = vmatmul.mubr.bf16.gmra.mrb[44].mxu0 %v3786_v24  ;;  %1681 = vmatmul.mubr.bf16.gmra.mrb[44].mxu1 %v3786_v24 }
 0x12c   :  { %1304 = vmatprep.mubr.bf16.mxu0 %v3858_v1  ;;  %1690 = vmatprep.mubr.bf16.mxu1 %v3858_v1 }
 0x133   :  { %1305 = vmatmul.mubr.bf16.gmra.mrb[48].mxu0 %v3787_v29  ;;  %1691 = vmatmul.mubr.bf16.gmra.mrb[48].mxu1 %v3787_v29 }
 0x134   :  { %1314 = vmatprep.mubr.bf16.mxu0 %v3858_v1  ;;  %1700 = vmatprep.mubr.bf16.mxu1 %v3858_v1 }
 0x13b   :  { %1315 = vmatmul.mubr.bf16.gmra.mrb[52].mxu0 %v3788_v30  ;;  %1701 = vmatmul.mubr.bf16.gmra.mrb[52].mxu1 %v3788_v30 }
 0x13c   :  { %1324 = vmatprep.mubr.bf16.mxu0 %v3858_v1  ;;  %1710 = vmatprep.mubr.bf16.mxu1 %v3858_v1 }
 0x143   :  { %1325 = vmatmul.mubr.bf16.gmra.mrb[56].mxu0 %v3789_v31  ;;  %1711 = vmatmul.mubr.bf16.gmra.mrb[56].mxu1 %v3789_v31 }
 0x144   :  { %1334 = vmatprep.mubr.bf16.mxu0 %v3858_v1  ;;  %1720 = vmatprep.mubr.bf16.mxu1 %v3858_v1 }
 0x14b   :  { %1335 = vmatmul.mubr.bf16.gmra.mrb[60].mxu0 %v3790_v32  ;;  %1721 = vmatmul.mubr.bf16.gmra.mrb[60].mxu1 %v3790_v32 }
 0x1a6   :  { %v1186_v45 = vpop.f32.mrb[0].mxu0  ;;  %v1572_v46 = vpop.f32.mrb[0].mxu1 }
 0x1a7   :  { %v3323_v47 = vadd.f32 %v1186_v45, %v4141_v41  ;;  %v3387_v48 = vadd.f32 %v1572_v46, %v4143_v42  ;;  %v1188_v49 = vpop.f32.mrb[1].mxu0  ;;  %v1574_v50 = vpop.f32.mrb[1].mxu1 }
 0x1a8   :  { %v3324_v51 = vadd.f32 %v1188_v49, %v4145_v43  ;;  %v3388_v52 = vadd.f32 %v1574_v50, %v4147_v44  ;;  %v1190_v53 = vpop.f32.mrb[2].mxu0  ;;  %v1576_v54 = vpop.f32.mrb[2].mxu1 }
 0x1a9   :  { %v3325_v55 = vadd.f32 %v1190_v53, %v4141_v41  ;;  %v3389_v56 = vadd.f32 %v1576_v54, %v4143_v42  ;;  %v1192_v57 = vpop.f32.mrb[3].mxu0  ;;  %v1578_v58 = vpop.f32.mrb[3].mxu1  ;;  %v1731_v61 = vmax.f32 %v3323_v47, 0.0  ;;  %v1733_v62 = vmax.f32 %v3387_v48, 0.0 }
 0x1aa   :  { %v3326_v59 = vadd.f32 %v1192_v57, %v4145_v43  ;;  %v3390_v60 = vadd.f32 %v1578_v58, %v4147_v44  ;;  %v1732_v1 = vmax.f32 %v3324_v51, 0.0  ;;  %v1734_v2 = vmax.f32 %v3388_v52, 0.0 }
 0x1ab   :  { %v1735_v63 = vmax.f32 %v3325_v55, 0.0  ;;  %v1737_v0 = vmax.f32 %v3389_v56, 0.0 }
 0x1ac   :  { %v1736_v3 = vmax.f32 %v3326_v59, 0.0  ;;  %v1738_v4 = vmax.f32 %v3390_v60, 0.0 }
 0x1ad   :  { %v1859_v5 = vpack.c.bf16 %v1735_v63, %v1731_v61  ;;  %v4157_v6 = vpack.c.bf16 %v1737_v0, %v1733_v62 }
 0x1ae   :  { %v1860_v7 = vpack.c.bf16 %v1736_v3, %v1732_v1  ;;  %v4159_v8 = vpack.c.bf16 %v1738_v4, %v1734_v2  ;;  %v1196_v9 = vpop.f32.mrb[4].mxu0  ;;  %v1582_v10 = vpop.f32.mrb[4].mxu1 }
 0x1af   :  { %v3327_v11 = vadd.f32 %v1196_v9, %v4141_v41  ;;  %v3391_v12 = vadd.f32 %v1582_v10, %v4143_v42  ;;  %v1198_v13 = vpop.f32.mrb[5].mxu0  ;;  %v1584_v14 = vpop.f32.mrb[5].mxu1 }
 0x1b0   :  { %v3328_v15 = vadd.f32 %v1198_v13, %v4145_v43  ;;  %v3392_v16 = vadd.f32 %v1584_v14, %v4147_v44  ;;  %v1200_v17 = vpop.f32.mrb[6].mxu0  ;;  %v1586_v18 = vpop.f32.mrb[6].mxu1  ;;  %2218 = vmatprep.mubr.bf16.mxu0 %v1860_v7 }
 0x1b1   :  { %v3329_v19 = vadd.f32 %v1200_v17, %v4141_v41  ;;  %v3393_v20 = vadd.f32 %v1586_v18, %v4143_v42  ;;  %v1202_v21 = vpop.f32.mrb[7].mxu0  ;;  %v1588_v22 = vpop.f32.mrb[7].mxu1  ;;  %2219 = vmatmul.mubr.bf16.vlgmr.msra.gmra.mrb[64].mxu0 %v1859_v5  ;;  %v1739_v25 = vmax.f32 %v3327_v11, 0.0  ;;  %v1741_v26 = vmax.f32 %v3391_v12, 0.0 }
 0x1b2   :  { %v3330_v23 = vadd.f32 %v1202_v21, %v4145_v43  ;;  %v3394_v24 = vadd.f32 %v1588_v22, %v4147_v44  ;;  %v1740_v29 = vmax.f32 %v3328_v15, 0.0  ;;  %v1742_v30 = vmax.f32 %v3392_v16, 0.0 }
 0x1b3   :  { %v1743_v27 = vmax.f32 %v3329_v19, 0.0  ;;  %v1745_v28 = vmax.f32 %v3393_v20, 0.0 }
 0x1b4   :  { %v1744_v31 = vmax.f32 %v3330_v23, 0.0  ;;  %v1746_v32 = vmax.f32 %v3394_v24, 0.0 }
 0x1b5   :  { %v1863_v33 = vpack.c.bf16 %v1743_v27, %v1739_v25  ;;  %v4169_v34 = vpack.c.bf16 %v1745_v28, %v1741_v26 }
 0x1b6   :  { %v1864_v35 = vpack.c.bf16 %v1744_v31, %v1740_v29  ;;  %v4171_v36 = vpack.c.bf16 %v1746_v32, %v1742_v30  ;;  %v1206_v37 = vpop.f32.mrb[8].mxu0  ;;  %v1592_v38 = vpop.f32.mrb[8].mxu1 }
 0x1b7   :  { %v3331_v39 = vadd.f32 %v1206_v37, %v4141_v41  ;;  %v3395_v40 = vadd.f32 %v1592_v38, %v4143_v42  ;;  %v1208_v45 = vpop.f32.mrb[9].mxu0  ;;  %v1594_v46 = vpop.f32.mrb[9].mxu1 }
 0x1b8   :  { %v3332_v47 = vadd.f32 %v1208_v45, %v4145_v43  ;;  %v3396_v48 = vadd.f32 %v1594_v46, %v4147_v44  ;;  %v1210_v49 = vpop.f32.mrb[10].mxu0  ;;  %v1596_v50 = vpop.f32.mrb[10].mxu1  ;;  %2226 = vmatprep.mubr.bf16.mxu0 %v1864_v35 }
 0x1b9   :  { %v3333_v51 = vadd.f32 %v1210_v49, %v4141_v41  ;;  %v3397_v52 = vadd.f32 %v1596_v50, %v4143_v42  ;;  %v1212_v53 = vpop.f32.mrb[11].mxu0  ;;  %v1598_v54 = vpop.f32.mrb[11].mxu1  ;;  %2227 = vmatmul.mubr.bf16.gmra.mrb[68].mxu0 %v1863_v33  ;;  %v1747_v57 = vmax.f32 %v3331_v39, 0.0  ;;  %v1749_v58 = vmax.f32 %v3395_v40, 0.0 }
 0x1ba   :  { %v3334_v55 = vadd.f32 %v1212_v53, %v4145_v43  ;;  %v3398_v56 = vadd.f32 %v1598_v54, %v4147_v44  ;;  %v1748_v61 = vmax.f32 %v3332_v47, 0.0  ;;  %v1750_v62 = vmax.f32 %v3396_v48, 0.0 }
 0x1bb   :  { %v1751_v59 = vmax.f32 %v3333_v51, 0.0  ;;  %v1753_v60 = vmax.f32 %v3397_v52, 0.0 }
 0x1bc   :  { %v1752_v63 = vmax.f32 %v3334_v55, 0.0  ;;  %v1754_v0 = vmax.f32 %v3398_v56, 0.0 }
 0x1bd   :  { %v1867_v1 = vpack.c.bf16 %v1751_v59, %v1747_v57  ;;  %v4181_v2 = vpack.c.bf16 %v1753_v60, %v1749_v58 }
 0x1be   :  { %v1868_v3 = vpack.c.bf16 %v1752_v63, %v1748_v61  ;;  %v4183_v4 = vpack.c.bf16 %v1754_v0, %v1750_v62  ;;  %v1216_v5 = vpop.f32.mrb[12].mxu0  ;;  %v1602_v7 = vpop.f32.mrb[12].mxu1 }
 0x1bf   :  { %v3335_v9 = vadd.f32 %v1216_v5, %v4141_v41  ;;  %v3399_v10 = vadd.f32 %v1602_v7, %v4143_v42  ;;  %v1218_v11 = vpop.f32.mrb[13].mxu0  ;;  %v1604_v12 = vpop.f32.mrb[13].mxu1 }
 0x1c0   :  { %v3336_v13 = vadd.f32 %v1218_v11, %v4145_v43  ;;  %v3400_v14 = vadd.f32 %v1604_v12, %v4147_v44  ;;  %v1220_v15 = vpop.f32.mrb[14].mxu0  ;;  %v1606_v16 = vpop.f32.mrb[14].mxu1  ;;  %2234 = vmatprep.mubr.bf16.mxu0 %v1868_v3 }
 0x1c1   :  { %v3337_v17 = vadd.f32 %v1220_v15, %v4141_v41  ;;  %v3401_v18 = vadd.f32 %v1606_v16, %v4143_v42  ;;  %v1222_v19 = vpop.f32.mrb[15].mxu0  ;;  %v1608_v20 = vpop.f32.mrb[15].mxu1  ;;  %2235 = vmatmul.mubr.bf16.gmra.mrb[72].mxu0 %v1867_v1  ;;  %v1755_v23 = vmax.f32 %v3335_v9, 0.0  ;;  %v1757_v24 = vmax.f32 %v3399_v10, 0.0 }
 0x1c2   :  { %v3338_v21 = vadd.f32 %v1222_v19, %v4145_v43  ;;  %v3402_v22 = vadd.f32 %v1608_v20, %v4147_v44  ;;  %v1756_v27 = vmax.f32 %v3336_v13, 0.0  ;;  %v1758_v28 = vmax.f32 %v3400_v14, 0.0 }
 0x1c3   :  { %v1759_v25 = vmax.f32 %v3337_v17, 0.0  ;;  %v1761_v26 = vmax.f32 %v3401_v18, 0.0 }
 0x1c4   :  { %v1760_v29 = vmax.f32 %v3338_v21, 0.0  ;;  %v1762_v30 = vmax.f32 %v3402_v22, 0.0 }
 0x1c5   :  { %v1871_v31 = vpack.c.bf16 %v1759_v25, %v1755_v23  ;;  %v4193_v32 = vpack.c.bf16 %v1761_v26, %v1757_v24 }
 0x1c6   :  { %v1872_v33 = vpack.c.bf16 %v1760_v29, %v1756_v27  ;;  %v4195_v35 = vpack.c.bf16 %v1762_v30, %v1758_v28  ;;  %v1226_v37 = vpop.f32.mrb[16].mxu0  ;;  %v1612_v38 = vpop.f32.mrb[16].mxu1 }
 0x1c7   :  { %v3339_v39 = vadd.f32 %v1226_v37, %v4141_v41  ;;  %v3403_v40 = vadd.f32 %v1612_v38, %v4143_v42  ;;  %v1228_v45 = vpop.f32.mrb[17].mxu0  ;;  %v1614_v46 = vpop.f32.mrb[17].mxu1 }
 0x1c8   :  { %v3340_v47 = vadd.f32 %v1228_v45, %v4145_v43  ;;  %v3404_v48 = vadd.f32 %v1614_v46, %v4147_v44  ;;  %v1230_v49 = vpop.f32.mrb[18].mxu0  ;;  %v1616_v50 = vpop.f32.mrb[18].mxu1  ;;  %2242 = vmatprep.mubr.bf16.mxu0 %v1872_v33 }
 0x1c9   :  { %v3341_v51 = vadd.f32 %v1230_v49, %v4141_v41  ;;  %v3405_v52 = vadd.f32 %v1616_v50, %v4143_v42  ;;  %v1232_v53 = vpop.f32.mrb[19].mxu0  ;;  %v1618_v54 = vpop.f32.mrb[19].mxu1  ;;  %2243 = vmatmul.mubr.bf16.gmra.mrb[76].mxu0 %v1871_v31  ;;  %v1763_v57 = vmax.f32 %v3339_v39, 0.0  ;;  %v1765_v58 = vmax.f32 %v3403_v40, 0.0 }
 0x1ca   :  { %v3342_v55 = vadd.f32 %v1232_v53, %v4145_v43  ;;  %v3406_v56 = vadd.f32 %v1618_v54, %v4147_v44  ;;  %v1764_v61 = vmax.f32 %v3340_v47, 0.0  ;;  %v1766_v62 = vmax.f32 %v3404_v48, 0.0 }
 0x1cb   :  { %v1767_v59 = vmax.f32 %v3341_v51, 0.0  ;;  %v1769_v60 = vmax.f32 %v3405_v52, 0.0 }
 0x1cc   :  { %v1768_v63 = vmax.f32 %v3342_v55, 0.0  ;;  %v1770_v0 = vmax.f32 %v3406_v56, 0.0 }
 0x1cd   :  { %v1875_v1 = vpack.c.bf16 %v1767_v59, %v1763_v57  ;;  %v4205_v3 = vpack.c.bf16 %v1769_v60, %v1765_v58 }
 0x1ce   :  { %v1876_v5 = vpack.c.bf16 %v1768_v63, %v1764_v61  ;;  %v4207_v7 = vpack.c.bf16 %v1770_v0, %v1766_v62  ;;  %v1236_v9 = vpop.f32.mrb[20].mxu0  ;;  %v1622_v10 = vpop.f32.mrb[20].mxu1 }
 0x1cf   :  { %v3343_v11 = vadd.f32 %v1236_v9, %v4141_v41  ;;  %v3407_v12 = vadd.f32 %v1622_v10, %v4143_v42  ;;  %v1238_v13 = vpop.f32.mrb[21].mxu0  ;;  %v1624_v14 = vpop.f32.mrb[21].mxu1 }
 0x1d0   :  { %v3344_v15 = vadd.f32 %v1238_v13, %v4145_v43  ;;  %v3408_v16 = vadd.f32 %v1624_v14, %v4147_v44  ;;  %v1240_v17 = vpop.f32.mrb[22].mxu0  ;;  %v1626_v18 = vpop.f32.mrb[22].mxu1  ;;  %2250 = vmatprep.mubr.bf16.mxu0 %v1876_v5 }
 0x1d1   :  { %v3345_v19 = vadd.f32 %v1240_v17, %v4141_v41  ;;  %v3409_v20 = vadd.f32 %v1626_v18, %v4143_v42  ;;  %v1242_v21 = vpop.f32.mrb[23].mxu0  ;;  %v1628_v22 = vpop.f32.mrb[23].mxu1  ;;  %2251 = vmatmul.mubr.bf16.gmra.mrb[80].mxu0 %v1875_v1  ;;  %v1771_v25 = vmax.f32 %v3343_v11, 0.0  ;;  %v1773_v26 = vmax.f32 %v3407_v12, 0.0 }
 0x1d2   :  { %v3346_v23 = vadd.f32 %v1242_v21, %v4145_v43  ;;  %v3410_v24 = vadd.f32 %v1628_v22, %v4147_v44  ;;  %v1772_v29 = vmax.f32 %v3344_v15, 0.0  ;;  %v1774_v30 = vmax.f32 %v3408_v16, 0.0 }
 0x1d3   :  { %v1775_v27 = vmax.f32 %v3345_v19, 0.0  ;;  %v1777_v28 = vmax.f32 %v3409_v20, 0.0 }
 0x1d4   :  { %v1776_v31 = vmax.f32 %v3346_v23, 0.0  ;;  %v1778_v33 = vmax.f32 %v3410_v24, 0.0 }
 0x1d5   :  { %v1879_v37 = vpack.c.bf16 %v1775_v27, %v1771_v25  ;;  %v4217_v38 = vpack.c.bf16 %v1777_v28, %v1773_v26 }
 0x1d6   :  { %v1880_v39 = vpack.c.bf16 %v1776_v31, %v1772_v29  ;;  %v4219_v40 = vpack.c.bf16 %v1778_v33, %v1774_v30  ;;  %v1246_v45 = vpop.f32.mrb[24].mxu0  ;;  %v1632_v46 = vpop.f32.mrb[24].mxu1 }
 0x1d7   :  { %v3347_v47 = vadd.f32 %v1246_v45, %v4141_v41  ;;  %v3411_v48 = vadd.f32 %v1632_v46, %v4143_v42  ;;  %v1248_v49 = vpop.f32.mrb[25].mxu0  ;;  %v1634_v50 = vpop.f32.mrb[25].mxu1 }
 0x1d8   :  { %v3348_v51 = vadd.f32 %v1248_v49, %v4145_v43  ;;  %v3412_v52 = vadd.f32 %v1634_v50, %v4147_v44  ;;  %v1250_v53 = vpop.f32.mrb[26].mxu0  ;;  %v1636_v54 = vpop.f32.mrb[26].mxu1  ;;  %2258 = vmatprep.mubr.bf16.mxu0 %v1880_v39 }
 0x1d9   :  { %v3349_v55 = vadd.f32 %v1250_v53, %v4141_v41  ;;  %v3413_v56 = vadd.f32 %v1636_v54, %v4143_v42  ;;  %v1252_v57 = vpop.f32.mrb[27].mxu0  ;;  %v1638_v58 = vpop.f32.mrb[27].mxu1  ;;  %2259 = vmatmul.mubr.bf16.gmra.mrb[84].mxu0 %v1879_v37  ;;  %v1779_v61 = vmax.f32 %v3347_v47, 0.0  ;;  %v1781_v62 = vmax.f32 %v3411_v48, 0.0 }
 0x1da   :  { %v3350_v59 = vadd.f32 %v1252_v57, %v4145_v43  ;;  %v3414_v60 = vadd.f32 %v1638_v58, %v4147_v44  ;;  %v1780_v1 = vmax.f32 %v3348_v51, 0.0  ;;  %v1782_v5 = vmax.f32 %v3412_v52, 0.0 }
 0x1db   :  { %v1783_v63 = vmax.f32 %v3349_v55, 0.0  ;;  %v1785_v0 = vmax.f32 %v3413_v56, 0.0 }
 0x1dc   :  { %v1784_v9 = vmax.f32 %v3350_v59, 0.0  ;;  %v1786_v10 = vmax.f32 %v3414_v60, 0.0 }
 0x1dd   :  { %v1883_v11 = vpack.c.bf16 %v1783_v63, %v1779_v61  ;;  %v4229_v12 = vpack.c.bf16 %v1785_v0, %v1781_v62 }
 0x1de   :  { %v1884_v13 = vpack.c.bf16 %v1784_v9, %v1780_v1  ;;  %v4231_v14 = vpack.c.bf16 %v1786_v10, %v1782_v5  ;;  %v1256_v15 = vpop.f32.mrb[28].mxu0  ;;  %v1642_v16 = vpop.f32.mrb[28].mxu1 }
 0x1df   :  { %v3351_v17 = vadd.f32 %v1256_v15, %v4141_v41  ;;  %v3415_v18 = vadd.f32 %v1642_v16, %v4143_v42  ;;  %v1258_v19 = vpop.f32.mrb[29].mxu0  ;;  %v1644_v20 = vpop.f32.mrb[29].mxu1 }
 0x1e0   :  { %v3352_v21 = vadd.f32 %v1258_v19, %v4145_v43  ;;  %v3416_v22 = vadd.f32 %v1644_v20, %v4147_v44  ;;  %v1260_v23 = vpop.f32.mrb[30].mxu0  ;;  %v1646_v24 = vpop.f32.mrb[30].mxu1  ;;  %2266 = vmatprep.mubr.bf16.mxu0 %v1884_v13 }
 0x1e1   :  { %v3353_v25 = vadd.f32 %v1260_v23, %v4141_v41  ;;  %v3417_v26 = vadd.f32 %v1646_v24, %v4143_v42  ;;  %v1262_v27 = vpop.f32.mrb[31].mxu0  ;;  %v1648_v28 = vpop.f32.mrb[31].mxu1  ;;  %2267 = vmatmul.mubr.bf16.gmra.mrb[88].mxu0 %v1883_v11  ;;  %v1787_v31 = vmax.f32 %v3351_v17, 0.0  ;;  %v1789_v33 = vmax.f32 %v3415_v18, 0.0 }
 0x1e2   :  { %v3354_v29 = vadd.f32 %v1262_v27, %v4145_v43  ;;  %v3418_v30 = vadd.f32 %v1648_v28, %v4147_v44  ;;  %v1788_v45 = vmax.f32 %v3352_v21, 0.0  ;;  %v1790_v46 = vmax.f32 %v3416_v22, 0.0 }
 0x1e3   :  { %v1791_v37 = vmax.f32 %v3353_v25, 0.0  ;;  %v1793_v39 = vmax.f32 %v3417_v26, 0.0 }
 0x1e4   :  { %v1792_v47 = vmax.f32 %v3354_v29, 0.0  ;;  %v1794_v48 = vmax.f32 %v3418_v30, 0.0 }
 0x1e5   :  { %v1887_v49 = vpack.c.bf16 %v1791_v37, %v1787_v31  ;;  %v4241_v50 = vpack.c.bf16 %v1793_v39, %v1789_v33 }
 0x1e6   :  { %v1888_v51 = vpack.c.bf16 %v1792_v47, %v1788_v45  ;;  %v4243_v52 = vpack.c.bf16 %v1794_v48, %v1790_v46  ;;  %v1266_v53 = vpop.f32.mrb[32].mxu0  ;;  %v1652_v54 = vpop.f32.mrb[32].mxu1 }
 0x1e7   :  { %v3355_v55 = vadd.f32 %v1266_v53, %v4141_v41  ;;  %v3419_v56 = vadd.f32 %v1652_v54, %v4143_v42  ;;  %v1268_v57 = vpop.f32.mrb[33].mxu0  ;;  %v1654_v58 = vpop.f32.mrb[33].mxu1 }
 0x1e8   :  { %v3356_v59 = vadd.f32 %v1268_v57, %v4145_v43  ;;  %v3420_v60 = vadd.f32 %v1654_v58, %v4147_v44  ;;  %v1270_v61 = vpop.f32.mrb[34].mxu0  ;;  %v1656_v62 = vpop.f32.mrb[34].mxu1  ;;  %2274 = vmatprep.mubr.bf16.mxu0 %v1888_v51 }
 0x1e9   :  { %v3357_v63 = vadd.f32 %v1270_v61, %v4141_v41  ;;  %v3421_v0 = vadd.f32 %v1656_v62, %v4143_v42  ;;  %v1272_v1 = vpop.f32.mrb[35].mxu0  ;;  %v1658_v5 = vpop.f32.mrb[35].mxu1  ;;  %2275 = vmatmul.mubr.bf16.gmra.mrb[92].mxu0 %v1887_v49  ;;  %v1795_v11 = vmax.f32 %v3355_v55, 0.0  ;;  %v1797_v13 = vmax.f32 %v3419_v56, 0.0 }
 0x1ea   :  { %v3358_v9 = vadd.f32 %v1272_v1, %v4145_v43  ;;  %v3422_v10 = vadd.f32 %v1658_v5, %v4147_v44  ;;  %v1796_v17 = vmax.f32 %v3356_v59, 0.0  ;;  %v1798_v18 = vmax.f32 %v3420_v60, 0.0 }
 0x1eb   :  { %v1799_v15 = vmax.f32 %v3357_v63, 0.0  ;;  %v1801_v16 = vmax.f32 %v3421_v0, 0.0 }
 0x1ec   :  { %v1800_v19 = vmax.f32 %v3358_v9, 0.0  ;;  %v1802_v20 = vmax.f32 %v3422_v10, 0.0 }
 0x1ed   :  { %v1891_v21 = vpack.c.bf16 %v1799_v15, %v1795_v11  ;;  %v4253_v22 = vpack.c.bf16 %v1801_v16, %v1797_v13 }
 0x1ee   :  { %v1892_v23 = vpack.c.bf16 %v1800_v19, %v1796_v17  ;;  %v4255_v24 = vpack.c.bf16 %v1802_v20, %v1798_v18  ;;  %v1276_v25 = vpop.f32.mrb[36].mxu0  ;;  %v1662_v26 = vpop.f32.mrb[36].mxu1 }
 0x1ef   :  { %v3359_v27 = vadd.f32 %v1276_v25, %v4141_v41  ;;  %v3423_v28 = vadd.f32 %v1662_v26, %v4143_v42  ;;  %v1278_v29 = vpop.f32.mrb[37].mxu0  ;;  %v1664_v30 = vpop.f32.mrb[37].mxu1 }
 0x1f0   :  { %v3360_v31 = vadd.f32 %v1278_v29, %v4145_v43  ;;  %v3424_v33 = vadd.f32 %v1664_v30, %v4147_v44  ;;  %v1280_v37 = vpop.f32.mrb[38].mxu0  ;;  %v1666_v39 = vpop.f32.mrb[38].mxu1  ;;  %2282 = vmatprep.mubr.bf16.mxu0 %v1892_v23 }
 0x1f1   :  { %v3361_v45 = vadd.f32 %v1280_v37, %v4141_v41  ;;  %v3425_v46 = vadd.f32 %v1666_v39, %v4143_v42  ;;  %v1282_v47 = vpop.f32.mrb[39].mxu0  ;;  %v1668_v48 = vpop.f32.mrb[39].mxu1  ;;  %2283 = vmatmul.mubr.bf16.gmra.mrb[96].mxu0 %v1891_v21  ;;  %v1803_v53 = vmax.f32 %v3359_v27, 0.0  ;;  %v1805_v54 = vmax.f32 %v3423_v28, 0.0 }
 0x1f2   :  { %v3362_v49 = vadd.f32 %v1282_v47, %v4145_v43  ;;  %v3426_v51 = vadd.f32 %v1668_v48, %v4147_v44  ;;  %v1804_v57 = vmax.f32 %v3360_v31, 0.0  ;;  %v1806_v58 = vmax.f32 %v3424_v33, 0.0 }
 0x1f3   :  { %v1807_v55 = vmax.f32 %v3361_v45, 0.0  ;;  %v1809_v56 = vmax.f32 %v3425_v46, 0.0 }
 0x1f4   :  { %v1808_v59 = vmax.f32 %v3362_v49, 0.0  ;;  %v1810_v60 = vmax.f32 %v3426_v51, 0.0 }
 0x1f5   :  { %v1895_v61 = vpack.c.bf16 %v1807_v55, %v1803_v53  ;;  %v4265_v62 = vpack.c.bf16 %v1809_v56, %v1805_v54 }
 0x1f6   :  { %v1896_v63 = vpack.c.bf16 %v1808_v59, %v1804_v57  ;;  %v4267_v0 = vpack.c.bf16 %v1810_v60, %v1806_v58  ;;  %v1286_v1 = vpop.f32.mrb[40].mxu0  ;;  %v1672_v5 = vpop.f32.mrb[40].mxu1 }
 0x1f7   :  { %v3363_v9 = vadd.f32 %v1286_v1, %v4141_v41  ;;  %v3427_v10 = vadd.f32 %v1672_v5, %v4143_v42  ;;  %v1288_v11 = vpop.f32.mrb[41].mxu0  ;;  %v1674_v13 = vpop.f32.mrb[41].mxu1 }
 0x1f8   :  { %v3364_v15 = vadd.f32 %v1288_v11, %v4145_v43  ;;  %v3428_v16 = vadd.f32 %v1674_v13, %v4147_v44  ;;  %v1290_v17 = vpop.f32.mrb[42].mxu0  ;;  %v1676_v18 = vpop.f32.mrb[42].mxu1  ;;  %2290 = vmatprep.mubr.bf16.mxu0 %v1896_v63 }
 0x1f9   :  { %v3365_v19 = vadd.f32 %v1290_v17, %v4141_v41  ;;  %v3429_v20 = vadd.f32 %v1676_v18, %v4143_v42  ;;  %v1292_v21 = vpop.f32.mrb[43].mxu0  ;;  %v1678_v23 = vpop.f32.mrb[43].mxu1  ;;  %2291 = vmatmul.mubr.bf16.gmra.mrb[100].mxu0 %v1895_v61  ;;  %v1811_v27 = vmax.f32 %v3363_v9, 0.0  ;;  %v1813_v28 = vmax.f32 %v3427_v10, 0.0 }
 0x1fa   :  { %v3366_v25 = vadd.f32 %v1292_v21, %v4145_v43  ;;  %v3430_v26 = vadd.f32 %v1678_v23, %v4147_v44  ;;  %v1812_v31 = vmax.f32 %v3364_v15, 0.0  ;;  %v1814_v33 = vmax.f32 %v3428_v16, 0.0 }
 0x1fb   :  { %v1815_v29 = vmax.f32 %v3365_v19, 0.0  ;;  %v1817_v30 = vmax.f32 %v3429_v20, 0.0 }
 0x1fc   :  { %v1816_v37 = vmax.f32 %v3366_v25, 0.0  ;;  %v1818_v39 = vmax.f32 %v3430_v26, 0.0 }
 0x1fd   :  { %v1899_v45 = vpack.c.bf16 %v1815_v29, %v1811_v27  ;;  %v4277_v46 = vpack.c.bf16 %v1817_v30, %v1813_v28 }
 0x1fe   :  { %v1900_v47 = vpack.c.bf16 %v1816_v37, %v1812_v31  ;;  %v4279_v48 = vpack.c.bf16 %v1818_v39, %v1814_v33  ;;  %v1296_v49 = vpop.f32.mrb[44].mxu0  ;;  %v1682_v51 = vpop.f32.mrb[44].mxu1 }
 0x1ff   :  { %v3367_v53 = vadd.f32 %v1296_v49, %v4141_v41  ;;  %v3431_v54 = vadd.f32 %v1682_v51, %v4143_v42  ;;  %v1298_v55 = vpop.f32.mrb[45].mxu0  ;;  %v1684_v56 = vpop.f32.mrb[45].mxu1 }
 0x200   :  { %v3368_v57 = vadd.f32 %v1298_v55, %v4145_v43  ;;  %v3432_v58 = vadd.f32 %v1684_v56, %v4147_v44  ;;  %v1300_v59 = vpop.f32.mrb[46].mxu0  ;;  %v1686_v60 = vpop.f32.mrb[46].mxu1  ;;  %2298 = vmatprep.mubr.bf16.mxu0 %v1900_v47 }
 0x201   :  { %v3369_v61 = vadd.f32 %v1300_v59, %v4141_v41  ;;  %v3433_v63 = vadd.f32 %v1686_v60, %v4143_v42  ;;  %v1302_v1 = vpop.f32.mrb[47].mxu0  ;;  %v1688_v5 = vpop.f32.mrb[47].mxu1  ;;  %2299 = vmatmul.mubr.bf16.gmra.mrb[104].mxu0 %v1899_v45  ;;  %v1819_v11 = vmax.f32 %v3367_v53, 0.0  ;;  %v1821_v13 = vmax.f32 %v3431_v54, 0.0 }
 0x202   :  { %v3370_v9 = vadd.f32 %v1302_v1, %v4145_v43  ;;  %v3434_v10 = vadd.f32 %v1688_v5, %v4147_v44  ;;  %v1820_v17 = vmax.f32 %v3368_v57, 0.0  ;;  %v1822_v18 = vmax.f32 %v3432_v58, 0.0 }
 0x203   :  { %v1823_v15 = vmax.f32 %v3369_v61, 0.0  ;;  %v1825_v16 = vmax.f32 %v3433_v63, 0.0 }
 0x204   :  { %v1824_v19 = vmax.f32 %v3370_v9, 0.0  ;;  %v1826_v20 = vmax.f32 %v3434_v10, 0.0 }
 0x205   :  { %v1903_v21 = vpack.c.bf16 %v1823_v15, %v1819_v11  ;;  %v4289_v23 = vpack.c.bf16 %v1825_v16, %v1821_v13 }
 0x206   :  { %v1904_v25 = vpack.c.bf16 %v1824_v19, %v1820_v17  ;;  %v4291_v26 = vpack.c.bf16 %v1826_v20, %v1822_v18  ;;  %v1306_v27 = vpop.f32.mrb[48].mxu0  ;;  %v1692_v28 = vpop.f32.mrb[48].mxu1  ;;  %v3808_v17 = vld [vmem:[%s4711_s3 + $0x80] sm:$0xff]  }
 0x207   :  { %v3371_v29 = vadd.f32 %v1306_v27, %v4141_v41  ;;  %v3435_v30 = vadd.f32 %v1692_v28, %v4143_v42  ;;  %v1308_v31 = vpop.f32.mrb[49].mxu0  ;;  %v1694_v33 = vpop.f32.mrb[49].mxu1 }
 0x208   :  { %v3372_v37 = vadd.f32 %v1308_v31, %v4145_v43  ;;  %v3436_v39 = vadd.f32 %v1694_v33, %v4147_v44  ;;  %v1310_v45 = vpop.f32.mrb[50].mxu0  ;;  %v1696_v47 = vpop.f32.mrb[50].mxu1  ;;  %2306 = vmatprep.mubr.bf16.mxu0 %v1904_v25  ;;  %v3809_v25 = vld [vmem:[%s4711_s3 + $0xc8] sm:$0xff]  }
 0x209   :  { %v3373_v49 = vadd.f32 %v1310_v45, %v4141_v41  ;;  %v3437_v51 = vadd.f32 %v1696_v47, %v4143_v42  ;;  %v1312_v53 = vpop.f32.mrb[51].mxu0  ;;  %v1698_v54 = vpop.f32.mrb[51].mxu1  ;;  %2307 = vmatmul.mubr.bf16.gmra.mrb[108].mxu0 %v1903_v21  ;;  %v1827_v57 = vmax.f32 %v3371_v29, 0.0  ;;  %v1829_v58 = vmax.f32 %v3435_v30, 0.0 }
 0x20a   :  { %v3374_v55 = vadd.f32 %v1312_v53, %v4145_v43  ;;  %v3438_v56 = vadd.f32 %v1698_v54, %v4147_v44  ;;  %v1828_v61 = vmax.f32 %v3372_v37, 0.0  ;;  %v1830_v63 = vmax.f32 %v3436_v39, 0.0 }
 0x20b   :  { %v1831_v59 = vmax.f32 %v3373_v49, 0.0  ;;  %v1833_v60 = vmax.f32 %v3437_v51, 0.0  ;;  %v3810_v49 = vld [vmem:[%s4711_s3 + $0x88] sm:$0xff]  }
 0x20c   :  { %v1832_v1 = vmax.f32 %v3374_v55, 0.0  ;;  %v1834_v5 = vmax.f32 %v3438_v56, 0.0  ;;  %v3811_v56 = vld [vmem:[%s4711_s3 + $0xd0] sm:$0xff]  }
 0x20d   :  { %v1907_v9 = vpack.c.bf16 %v1831_v59, %v1827_v57  ;;  %v4301_v10 = vpack.c.bf16 %v1833_v60, %v1829_v58 }
 0x20e   :  { %v1908_v11 = vpack.c.bf16 %v1832_v1, %v1828_v61  ;;  %v4303_v13 = vpack.c.bf16 %v1834_v5, %v1830_v63  ;;  %v1316_v15 = vpop.f32.mrb[52].mxu0  ;;  %v1702_v16 = vpop.f32.mrb[52].mxu1 }
 0x20f   :  { %v3375_v18 = vadd.f32 %v1316_v15, %v4141_v41  ;;  %v3439_v19 = vadd.f32 %v1702_v16, %v4143_v42  ;;  %v1318_v20 = vpop.f32.mrb[53].mxu0  ;;  %v1704_v21 = vpop.f32.mrb[53].mxu1  ;;  %v3812_v15 = vld [vmem:[%s4711_s3 + $0x90] sm:$0xff]  }
 0x210   :  { %v3376_v27 = vadd.f32 %v1318_v20, %v4145_v43  ;;  %v3440_v28 = vadd.f32 %v1704_v21, %v4147_v44  ;;  %v1320_v29 = vpop.f32.mrb[54].mxu0  ;;  %v1706_v30 = vpop.f32.mrb[54].mxu1  ;;  %2314 = vmatprep.mubr.bf16.mxu1 %v1908_v11  ;;  %v3813_v20 = vld [vmem:[%s4711_s3 + $0xd8] sm:$0xff]  }
 0x211   :  { %v3377_v31 = vadd.f32 %v1320_v29, %v4141_v41  ;;  %v3441_v33 = vadd.f32 %v1706_v30, %v4143_v42  ;;  %v1322_v37 = vpop.f32.mrb[55].mxu0  ;;  %v1708_v39 = vpop.f32.mrb[55].mxu1  ;;  %2315 = vmatmul.mubr.bf16.vlgmr.msra.gmra.mrb[64].mxu1 %v1907_v9  ;;  %v1835_v51 = vmax.f32 %v3375_v18, 0.0  ;;  %v1837_v53 = vmax.f32 %v3439_v19, 0.0 }
 0x212   :  { %v3378_v45 = vadd.f32 %v1322_v37, %v4145_v43  ;;  %v3442_v47 = vadd.f32 %v1708_v39, %v4147_v44  ;;  %3124 = vmatpush3.bf16.msra.mxu1 %v3808_v17  ;;  %v1836_v57 = vmax.f32 %v3376_v27, 0.0  ;;  %v1838_v58 = vmax.f32 %v3440_v28, 0.0 }
 0x213   :  { %v1839_v54 = vmax.f32 %v3377_v31, 0.0  ;;  %v1841_v55 = vmax.f32 %v3441_v33, 0.0  ;;  %3125 = vmatprep.subr.bf16.mxu1 %v3809_v25 }
 0x214   :  { %v1840_v59 = vmax.f32 %v3378_v45, 0.0  ;;  %v1842_v60 = vmax.f32 %v3442_v47, 0.0  ;;  %v3814_v45 = vld [vmem:[%s4711_s3 + $0x98] sm:$0xff]  }
 0x215   :  { %v1911_v61 = vpack.c.bf16 %v1839_v54, %v1835_v51  ;;  %v4325_v63 = vpack.c.bf16 %v1841_v55, %v1837_v53  ;;  %v3815_v54 = vld [vmem:[%s4711_s3 + $0xe0] sm:$0xff]  }
 0x216   :  { %v1912_v1 = vpack.c.bf16 %v1840_v59, %v1836_v57  ;;  %v4327_v5 = vpack.c.bf16 %v1842_v60, %v1838_v58  ;;  %v1326_v9 = vpop.f32.mrb[56].mxu0  ;;  %v1712_v11 = vpop.f32.mrb[56].mxu1  ;;  %3126 = vmatpush3.bf16.msra.mxu1 %v3810_v49 }
 0x217   :  { %v3379_v16 = vadd.f32 %v1326_v9, %v4141_v41  ;;  %v3443_v17 = vadd.f32 %v1712_v11, %v4143_v42  ;;  %v1328_v18 = vpop.f32.mrb[57].mxu0  ;;  %v1714_v19 = vpop.f32.mrb[57].mxu1  ;;  %3127 = vmatprep.subr.bf16.mxu1 %v3811_v56 }
 0x218   :  { %v3380_v21 = vadd.f32 %v1328_v18, %v4145_v43  ;;  %v3444_v25 = vadd.f32 %v1714_v19, %v4147_v44  ;;  %v1330_v27 = vpop.f32.mrb[58].mxu0  ;;  %v1716_v28 = vpop.f32.mrb[58].mxu1  ;;  %2322 = vmatprep.mubr.bf16.mxu1 %v1912_v1 }
 0x219   :  { %v3381_v29 = vadd.f32 %v1330_v27, %v4141_v41  ;;  %v3445_v30 = vadd.f32 %v1716_v28, %v4143_v42  ;;  %v1332_v31 = vpop.f32.mrb[59].mxu0  ;;  %v1718_v33 = vpop.f32.mrb[59].mxu1  ;;  %2323 = vmatmul.mubr.bf16.gmra.mrb[68].mxu1 %v1911_v61  ;;  %v1843_v47 = vmax.f32 %v3379_v16, 0.0  ;;  %v1845_v49 = vmax.f32 %v3443_v17, 0.0 }
 0x21a   :  { %v3382_v37 = vadd.f32 %v1332_v31, %v4145_v43  ;;  %v3446_v39 = vadd.f32 %v1718_v33, %v4147_v44  ;;  %3128 = vmatpush3.bf16.msra.mxu1 %v3812_v15  ;;  %v1844_v55 = vmax.f32 %v3380_v21, 0.0  ;;  %v1846_v56 = vmax.f32 %v3444_v25, 0.0  ;;  %v3816_v15 = vld [vmem:[%s4711_s3 + $0xa0] sm:$0xff]  }
 0x21b   :  { %v1847_v51 = vmax.f32 %v3381_v29, 0.0  ;;  %v1849_v53 = vmax.f32 %v3445_v30, 0.0  ;;  %3129 = vmatprep.subr.bf16.mxu1 %v3813_v20  ;;  %v3817_v20 = vld [vmem:[%s4711_s3 + $0xe8] sm:$0xff]  }
 0x21c   :  { %v1848_v57 = vmax.f32 %v3382_v37, 0.0  ;;  %v1850_v58 = vmax.f32 %v3446_v39, 0.0 }
 0x21d   :  { %v1915_v59 = vpack.c.bf16 %v1847_v51, %v1843_v47  ;;  %v4349_v60 = vpack.c.bf16 %v1849_v53, %v1845_v49 }
 0x21e   :  { %v1916_v61 = vpack.c.bf16 %v1848_v57, %v1844_v55  ;;  %v4351_v1 = vpack.c.bf16 %v1850_v58, %v1846_v56  ;;  %v1336_v9 = vpop.f32.mrb[60].mxu0  ;;  %v1722_v11 = vpop.f32.mrb[60].mxu1  ;;  %3130 = vmatpush3.bf16.msra.mxu1 %v3814_v45  ;;  %v3818_v45 = vld [vmem:[%s4711_s3 + $0xa8] sm:$0xff]  }
 0x21f   :  { %v3383_v16 = vadd.f32 %v1336_v9, %v4141_v41  ;;  %v3447_v17 = vadd.f32 %v1722_v11, %v4143_v42  ;;  %v1338_v18 = vpop.f32.mrb[61].mxu0  ;;  %v1724_v19 = vpop.f32.mrb[61].mxu1  ;;  %3131 = vmatprep.subr.bf16.mxu1 %v3815_v54  ;;  %v3822_v9 = vld [vmem:[%s4711_s3 + $0xb8] sm:$0xff]  }
 0x220   :  { %v3384_v21 = vadd.f32 %v1338_v18, %v4145_v43  ;;  %v3448_v25 = vadd.f32 %v1724_v19, %v4147_v44  ;;  %v1340_v27 = vpop.f32.mrb[62].mxu0  ;;  %v1726_v28 = vpop.f32.mrb[62].mxu1  ;;  %2330 = vmatprep.mubr.bf16.mxu1 %v1916_v61  ;;  %v3821_v61 = vld [vmem:[%s4711_s3 + $0xf8] sm:$0xff]  }
 0x221   :  { %v3385_v29 = vadd.f32 %v1340_v27, %v4141_v41  ;;  %v3449_v30 = vadd.f32 %v1726_v28, %v4143_v42  ;;  %v1342_v31 = vpop.f32.mrb[63].mxu0  ;;  %v1728_v33 = vpop.f32.mrb[63].mxu1  ;;  %2331 = vmatmul.mubr.bf16.gmra.mrb[72].mxu1 %v1915_v59  ;;  %v1851_v47 = vmax.f32 %v3383_v16, 0.0  ;;  %v1853_v49 = vmax.f32 %v3447_v17, 0.0  ;;  %v3819_v41 = vld [vmem:[%s4711_s3 + $0xf0] sm:$0xff]  }
 0x222   :  { %v3386_v37 = vadd.f32 %v1342_v31, %v4145_v43  ;;  %v3450_v39 = vadd.f32 %v1728_v33, %v4147_v44  ;;  %3132 = vmatpush3.bf16.msra.mxu1 %v3816_v15  ;;  %v1852_v42 = vmax.f32 %v3384_v21, 0.0  ;;  %v1854_v54 = vmax.f32 %v3448_v25, 0.0  ;;  %v3820_v59 = vld [vmem:[%s4711_s3 + $0xb0] sm:$0xff]  }
 0x223   :  { %v1855_v51 = vmax.f32 %v3385_v29, 0.0  ;;  %v1857_v53 = vmax.f32 %v3449_v30, 0.0  ;;  %3133 = vmatprep.subr.bf16.mxu1 %v3817_v20 }
 0x224   :  { %v1856_v55 = vmax.f32 %v3386_v37, 0.0  ;;  %v1858_v43 = vmax.f32 %v3450_v39, 0.0 }
 0x225   :  { %v1919_v56 = vpack.c.bf16 %v1855_v51, %v1851_v47  ;;  %v4373_v44 = vpack.c.bf16 %v1857_v53, %v1853_v49 }
 0x226   :  { %v1920_v57 = vpack.c.bf16 %v1856_v55, %v1852_v42  ;;  %v4375_v58 = vpack.c.bf16 %v1858_v43, %v1854_v54  ;;  %3134 = vmatpush3.bf16.msra.mxu1 %v3818_v45 }
 0x227   :  { %3135 = vmatprep.subr.bf16.mxu1 %v3819_v41 }
 0x228   :  { %2338 = vmatprep.mubr.bf16.mxu1 %v1920_v57 }
 0x229   :  { %2339 = vmatmul.mubr.bf16.gmra.mrb[76].mxu1 %v1919_v56 }
 0x22a   :  { %3136 = vmatpush3.bf16.msra.mxu1 %v3820_v59  ;;  %2379 = vmatprep.mubr.bf16.mxu1 %v4159_v8  ;;  %v3824_v8 = vld [vmem:[%s4713_s5 + $0x8] sm:$0xff]  }
 0x22b   :  { %3137 = vmatprep.subr.bf16.mxu1 %v3821_v61 }
 0x22e   :  { %3138 = vmatpush3.bf16.msra.mxu1 %v3822_v9 }
 0x231   :  { %2380 = vmatmul.mubr.bf16.vlgmr.msra.gmra.mrb[80].mxu1 %v4157_v6  ;;  %v3823_v6 = vld [vmem:[%s4713_s5] sm:$0xff]  }
 0x232   :  { %2387 = vmatprep.mubr.bf16.mxu1 %v4171_v36  ;;  %3259 = vmatprep.subr.bf16.mxu0 %v3823_v6  ;;  %v3826_v36 = vld [vmem:[%s4713_s5 + $0x18] sm:$0xff]  }
 0x233   :  { %3260 = vmatpush3.bf16.msra.mxu0 %v3823_v6 }
 0x234   :  { %3261 = vmatprep.subr.bf16.mxu0 %v3824_v8 }
 0x237   :  { %3262 = vmatpush3.bf16.msra.mxu0 %v3824_v8 }
 0x239   :  { %2388 = vmatmul.mubr.bf16.gmra.mrb[84].mxu1 %v4169_v34  ;;  %v3825_v34 = vld [vmem:[%s4713_s5 + $0x10] sm:$0xff]  }
 0x23a   :  { %2395 = vmatprep.mubr.bf16.mxu1 %v4183_v4  ;;  %3263 = vmatprep.subr.bf16.mxu0 %v3825_v34 }
 0x23b   :  { %3264 = vmatpush3.bf16.msra.mxu0 %v3825_v34 }
 0x23c   :  { %3265 = vmatprep.subr.bf16.mxu0 %v3826_v36 }
 0x23f   :  { %3266 = vmatpush3.bf16.msra.mxu0 %v3826_v36 }
 0x241   :  { %2396 = vmatmul.mubr.bf16.gmra.mrb[88].mxu1 %v4181_v2 }
 0x242   :  { %2403 = vmatprep.mubr.bf16.mxu1 %v4195_v35 }
 0x249   :  { %2404 = vmatmul.mubr.bf16.gmra.mrb[92].mxu1 %v4193_v32 }
 0x24a   :  { %2411 = vmatprep.mubr.bf16.mxu1 %v4207_v7 }
 0x251   :  { %2412 = vmatmul.mubr.bf16.gmra.mrb[96].mxu1 %v4205_v3  ;;  %v3827_v3 = vld [vmem:[%s4713_s5 + $0x20] sm:$0xff]  }
 0x252   :  { %2419 = vmatprep.mubr.bf16.mxu1 %v4219_v40  ;;  %3267 = vmatprep.subr.bf16.mxu0 %v3827_v3  ;;  %v3828_v40 = vld [vmem:[%s4713_s5 + $0x28] sm:$0xff]  }
 0x253   :  { %3268 = vmatpush3.bf16.msra.mxu0 %v3827_v3 }
 0x254   :  { %3269 = vmatprep.subr.bf16.mxu0 %v3828_v40 }
 0x257   :  { %3270 = vmatpush3.bf16.msra.mxu0 %v3828_v40 }
 0x259   :  { %2420 = vmatmul.mubr.bf16.gmra.mrb[100].mxu1 %v4217_v38 }
 0x25a   :  { %2427 = vmatprep.mubr.bf16.mxu1 %v4231_v14 }
 0x261   :  { %2428 = vmatmul.mubr.bf16.gmra.mrb[104].mxu1 %v4229_v12 }
 0x262   :  { %2435 = vmatprep.mubr.bf16.mxu1 %v4243_v52 }
 0x269   :  { %2436 = vmatmul.mubr.bf16.gmra.mrb[108].mxu1 %v4241_v50 }
 0x26a   :  { %2443 = vmatprep.mubr.bf16.mxu1 %v4255_v24 }
 0x271   :  { %2444 = vmatmul.mubr.bf16.gmra.mrb[112].mxu1 %v4253_v22  ;;  %v3829_v22 = vld [vmem:[%s4713_s5 + $0x30] sm:$0xff]  }
 0x272   :  { %2451 = vmatprep.mubr.bf16.mxu1 %v4267_v0  ;;  %3271 = vmatprep.subr.bf16.mxu0 %v3829_v22  ;;  %v3830_v0 = vld [vmem:[%s4713_s5 + $0x38] sm:$0xff]  }
 0x273   :  { %3272 = vmatpush3.bf16.msra.mxu0 %v3829_v22 }
 0x274   :  { %3273 = vmatprep.subr.bf16.mxu0 %v3830_v0 }
 0x277   :  { %3274 = vmatpush3.bf16.msra.mxu0 %v3830_v0 }
 0x279   :  { %2452 = vmatmul.mubr.bf16.gmra.mrb[116].mxu1 %v4265_v62 }
 0x27a   :  { %2459 = vmatprep.mubr.bf16.mxu1 %v4279_v48 }
 0x281   :  { %2460 = vmatmul.mubr.bf16.gmra.mrb[120].mxu1 %v4277_v46 }
 0x282   :  { %2467 = vmatprep.mubr.bf16.mxu1 %v4291_v26 }
 0x284   :  { %v3027_v2 = vpop.f32.mrb[64].mxu0 }
 0x285   :  { %v3028_v4 = vpop.f32.mrb[65].mxu0 }
 0x286   :  { %v4421_v32 = vadd.f32 %v3028_v4, %v3027_v2  ;;  %v3030_v35 = vpop.f32.mrb[66].mxu0 }
 0x287   :  { %v3031_v7 = vpop.f32.mrb[67].mxu0 }
 0x288   :  { %v4426_v38 = vadd.f32 %v3031_v7, %v3030_v35 }
 0x289   :  { %2468 = vmatmul.mubr.bf16.gmra.mrb[124].mxu1 %v4289_v23 }
 0x28a   :  { %2475 = vmatprep.mubr.bf16.mxu1 %v4303_v13 }
 0x28c   :  { %v3033_v12 = vpop.f32.mrb[68].mxu0 }
 0x28d   :  { %v3034_v14 = vpop.f32.mrb[69].mxu0 }
 0x28e   :  { %v4433_v50 = vadd.f32 %v3034_v14, %v3033_v12  ;;  %v3036_v52 = vpop.f32.mrb[70].mxu0 }
 0x28f   :  { %v3037_v24 = vpop.f32.mrb[71].mxu0 }
 0x290   :  { %v4438_v62 = vadd.f32 %v3037_v24, %v3036_v52 }
 0x291   :  { %2476 = vmatmul.mubr.bf16.gmra.mrb[128].mxu1 %v4301_v10 }
 0x292   :  { %2483 = vmatprep.mubr.bf16.mxu1 %v4327_v5 }
 0x294   :  { %v3039_v46 = vpop.f32.mrb[72].mxu0 }
 0x295   :  { %v3040_v48 = vpop.f32.mrb[73].mxu0 }
 0x296   :  { %v4445_v23 = vadd.f32 %v3040_v48, %v3039_v46  ;;  %v3042_v26 = vpop.f32.mrb[74].mxu0 }
 0x297   :  { %v3043_v13 = vpop.f32.mrb[75].mxu0 }
 0x298   :  { %v4447_v11 = vadd.f32 %v3043_v13, %v3042_v26 }
 0x299   :  { %2484 = vmatmul.mubr.bf16.gmra.mrb[132].mxu1 %v4325_v63 }
 0x29a   :  { %2491 = vmatprep.mubr.bf16.mxu1 %v4351_v1 }
 0x29c   :  { %v3045_v10 = vpop.f32.mrb[76].mxu0 }
 0x29d   :  { %v3046_v5 = vpop.f32.mrb[77].mxu0 }
 0x29e   :  { %v4451_v15 = vadd.f32 %v3046_v5, %v3045_v10  ;;  %v3048_v16 = vpop.f32.mrb[78].mxu0 }
 0x29f   :  { %v3049_v17 = vpop.f32.mrb[79].mxu0 }
 0x2a0   :  { %v4453_v18 = vadd.f32 %v3049_v17, %v3048_v16 }
 0x2a1   :  { %2492 = vmatmul.mubr.bf16.gmra.mrb[136].mxu1 %v4349_v60 }
 0x2a2   :  { %2499 = vmatprep.mubr.bf16.mxu1 %v4375_v58 }
 0x2a4   :  { %v3051_v19 = vpop.f32.mrb[80].mxu0 }
 0x2a5   :  { %v3052_v20 = vpop.f32.mrb[81].mxu0 }
 0x2a6   :  { %v4457_v21 = vadd.f32 %v3052_v20, %v3051_v19  ;;  %v3054_v25 = vpop.f32.mrb[82].mxu0 }
 0x2a7   :  { %v3055_v63 = vpop.f32.mrb[83].mxu0 }
 0x2a8   :  { %v4459_v27 = vadd.f32 %v3055_v63, %v3054_v25 }
 0x2a9   :  { %2500 = vmatmul.mubr.bf16.gmra.mrb[140].mxu1 %v4373_v44 }
 0x2ac   :  { %v3057_v1 = vpop.f32.mrb[84].mxu0 }
 0x2ad   :  { %v3058_v28 = vpop.f32.mrb[85].mxu0 }
 0x2ae   :  { %v4462_v29 = vadd.f32 %v3058_v28, %v3057_v1  ;;  %v3060_v30 = vpop.f32.mrb[86].mxu0 }
 0x2af   :  { %v3061_v31 = vpop.f32.mrb[87].mxu0 }
 0x2b0   :  { %v4464_v33 = vadd.f32 %v3061_v31, %v3060_v30 }
 0x2b4   :  { %v3063_v60 = vpop.f32.mrb[88].mxu0 }
 0x2b5   :  { %v3064_v37 = vpop.f32.mrb[89].mxu0 }
 0x2b6   :  { %v4466_v39 = vadd.f32 %v3064_v37, %v3063_v60  ;;  %v3066_v45 = vpop.f32.mrb[90].mxu0 }
 0x2b7   :  { %v3067_v47 = vpop.f32.mrb[91].mxu0 }
 0x2b8   :  { %v4468_v49 = vadd.f32 %v3067_v47, %v3066_v45 }
 0x2bc   :  { %v3069_v51 = vpop.f32.mrb[92].mxu0 }
 0x2bd   :  { %v3070_v53 = vpop.f32.mrb[93].mxu0 }
 0x2be   :  { %v4470_v41 = vadd.f32 %v3070_v53, %v3069_v51  ;;  %v3072_v42 = vpop.f32.mrb[94].mxu0 }
 0x2bf   :  { %v3073_v54 = vpop.f32.mrb[95].mxu0 }
 0x2c0   :  { %v4472_v55 = vadd.f32 %v3073_v54, %v3072_v42 }
 0x2c4   :  { %v3075_v43 = vpop.f32.mrb[96].mxu0 }
 0x2c5   :  { %v3076_v56 = vpop.f32.mrb[97].mxu0 }
 0x2c6   :  { %v4474_v44 = vadd.f32 %v3076_v56, %v3075_v43  ;;  %v3078_v57 = vpop.f32.mrb[98].mxu0  ;;  %v4509_v43 = vld [vmem:[%s4712_s4] ss:$0 sm:$0xff] }
 0x2c7   :  { %v3079_v58 = vpop.f32.mrb[99].mxu0 }
 0x2c8   :  { %v4476_v59 = vadd.f32 %v3079_v58, %v3078_v57  ;;  %v2221_v58 = vadd.f32 %v4421_v32, %v4509_v43 }
 0x2cc   :  { %v3081_v61 = vpop.f32.mrb[100].mxu0 }
 0x2cd   :  { %v3082_v9 = vpop.f32.mrb[101].mxu0 }
 0x2ce   :  { %v4478_v6 = vadd.f32 %v3082_v9, %v3081_v61  ;;  %v3084_v8 = vpop.f32.mrb[102].mxu0 }
 0x2cf   :  { %v3085_v34 = vpop.f32.mrb[103].mxu0 }
 0x2d0   :  { %v4480_v36 = vadd.f32 %v3085_v34, %v3084_v8  ;;  %v2224_v34 = vadd.f32 %v4426_v38, %v4509_v43 }
 0x2d4   :  { %v3087_v2 = vpop.f32.mrb[104].mxu0 }
 0x2d5   :  { %v3088_v4 = vpop.f32.mrb[105].mxu0 }
 0x2d6   :  { %v4482_v35 = vadd.f32 %v3088_v4, %v3087_v2  ;;  %v3090_v3 = vpop.f32.mrb[106].mxu0 }
 0x2d7   :  { %v3091_v7 = vpop.f32.mrb[107].mxu0 }
 0x2d8   :  { %v4484_v40 = vadd.f32 %v3091_v7, %v3090_v3 }
 0x2dc   :  { %v3093_v12 = vpop.f32.mrb[108].mxu0 }
 0x2dd   :  { %v3094_v14 = vpop.f32.mrb[109].mxu0 }
 0x2de   :  { %v4486_v52 = vadd.f32 %v3094_v14, %v3093_v12  ;;  %v3096_v22 = vpop.f32.mrb[110].mxu0 }
 0x2df   :  { %v3097_v24 = vpop.f32.mrb[111].mxu0 }
 0x2e0   :  { %v4488_v0 = vadd.f32 %v3097_v24, %v3096_v22  ;;  %v2229_v24 = vadd.f32 %v4433_v50, %v4509_v43 }
 0x2e4   :  { %v3099_v46 = vpop.f32.mrb[64].mxu1 }
 0x2e5   :  { %v3100_v48 = vpop.f32.mrb[65].mxu1 }
 0x2e6   :  { %v4490_v26 = vadd.f32 %v3100_v48, %v3099_v46  ;;  %v3102_v13 = vpop.f32.mrb[66].mxu1 }
 0x2e7   :  { %v3103_v10 = vpop.f32.mrb[67].mxu1 }
 0x2e8   :  { %v4492_v5 = vadd.f32 %v3103_v10, %v3102_v13  ;;  %v2232_v10 = vadd.f32 %v4438_v62, %v4509_v43 }
 0x2ec   :  { %v3105_v16 = vpop.f32.mrb[68].mxu1 }
 0x2ed   :  { %v3106_v17 = vpop.f32.mrb[69].mxu1 }
 0x2ee   :  { %v4494_v19 = vadd.f32 %v3106_v17, %v3105_v16  ;;  %v3108_v20 = vpop.f32.mrb[70].mxu1 }
 0x2ef   :  { %v3109_v25 = vpop.f32.mrb[71].mxu1 }
 0x2f0   :  { %v4496_v63 = vadd.f32 %v3109_v25, %v3108_v20 }
 0x2f4   :  { %v3111_v1 = vpop.f32.mrb[72].mxu1 }
 0x2f5   :  { %v3112_v28 = vpop.f32.mrb[73].mxu1 }
 0x2f6   :  { %v4498_v30 = vadd.f32 %v3112_v28, %v3111_v1  ;;  %v3114_v31 = vpop.f32.mrb[74].mxu1 }
 0x2f7   :  { %v3115_v60 = vpop.f32.mrb[75].mxu1 }
 0x2f8   :  { %v4500_v37 = vadd.f32 %v3115_v60, %v3114_v31  ;;  %v2237_v31 = vadd.f32 %v4445_v23, %v4509_v43 }
 0x2fc   :  { %v3117_v45 = vpop.f32.mrb[76].mxu1 }
 0x2fd   :  { %v3118_v47 = vpop.f32.mrb[77].mxu1 }
 0x2fe   :  { %v4502_v51 = vadd.f32 %v3118_v47, %v3117_v45  ;;  %v3120_v53 = vpop.f32.mrb[78].mxu1 }
 0x2ff   :  { %v3121_v42 = vpop.f32.mrb[79].mxu1 }
 0x300   :  { %v4504_v54 = vadd.f32 %v3121_v42, %v3120_v53  ;;  %v2240_v53 = vadd.f32 %v4447_v11, %v4509_v43 }
 0x304   :  { %v3139_v56 = vpop.f32.mrb[80].mxu1 }
 0x305   :  { %v3140_v57 = vpop.f32.mrb[81].mxu1 }
 0x306   :  { %v3141_v61 = vadd.f32 %v3140_v57, %v3139_v56  ;;  %v3142_v9 = vpop.f32.mrb[82].mxu1 }
 0x307   :  { %v3143_v8 = vpop.f32.mrb[83].mxu1 }
 0x308   :  { %v2382_v2 = vadd.f32 %v3141_v61, %v2221_v58  ;;  %v3144_v4 = vadd.f32 %v3143_v8, %v3142_v9  ;;  %v2245_v8 = vadd.f32 %v4451_v15, %v4509_v43 }
 0x30a   :  { %v2385_v3 = vadd.f32 %v3144_v4, %v2224_v34  ;;  %v2508_v7 = vmax.f32 %v2382_v2, 0.0 }
 0x30c   :  { %v2509_v12 = vmax.f32 %v2385_v3, 0.0  ;;  %v3145_v14 = vpop.f32.mrb[84].mxu1  ;;  %v2248_v3 = vadd.f32 %v4453_v18, %v4509_v43 }
 0x30d   :  { %v3146_v22 = vpop.f32.mrb[85].mxu1 }
 0x30e   :  { %v3147_v46 = vadd.f32 %v3146_v22, %v3145_v14  ;;  %v3148_v48 = vpop.f32.mrb[86].mxu1  ;;  %v2540_v13 = vpack.c.bf16 %v2509_v12, %v2508_v7 }
 0x30f   :  { %v3149_v32 = vpop.f32.mrb[87].mxu1 }
 0x310   :  { %v2390_v16 = vadd.f32 %v3147_v46, %v2229_v24  ;;  %v3150_v17 = vadd.f32 %v3149_v32, %v3148_v48  ;;  %3275 = vmatprep.mubr.bf16.mxu0 %v2540_v13  ;;  %v2253_v48 = vadd.f32 %v4457_v21, %v4509_v43 }
 0x312   :  { %v2393_v38 = vadd.f32 %v3150_v17, %v2232_v10  ;;  %v2510_v20 = vmax.f32 %v2390_v16, 0.0  ;;  %v2256_v16 = vadd.f32 %v4459_v27, %v4509_v43 }
 0x314   :  { %v2511_v25 = vmax.f32 %v2393_v38, 0.0  ;;  %v3151_v1 = vpop.f32.mrb[88].mxu1 }
 0x315   :  { %v3152_v28 = vpop.f32.mrb[89].mxu1 }
 0x316   :  { %v2541_v60 = vpack.c.bf16 %v2511_v25, %v2510_v20  ;;  %v3153_v50 = vadd.f32 %v3152_v28, %v3151_v1  ;;  %v3154_v45 = vpop.f32.mrb[90].mxu1 }
 0x317   :  { %v3155_v47 = vpop.f32.mrb[91].mxu1 }
 0x318   :  { %v2398_v42 = vadd.f32 %v3153_v50, %v2237_v31  ;;  %v3156_v62 = vadd.f32 %v3155_v47, %v3154_v45  ;;  %3276 = vmatmul.mubr.bf16.vlgmr.msra.gmra.mrb[112].mxu0 %v2541_v60  ;;  %v2261_v31 = vadd.f32 %v4462_v29, %v4509_v43  ;;  %v2264_v47 = vadd.f32 %v4464_v33, %v4509_v43 }
 0x31a   :  { %v2401_v56 = vadd.f32 %v3156_v62, %v2240_v53  ;;  %v2512_v57 = vmax.f32 %v2398_v42, 0.0 }
 0x31c   :  { %v2513_v58 = vmax.f32 %v2401_v56, 0.0  ;;  %v3157_v61 = vpop.f32.mrb[92].mxu1 }
 0x31d   :  { %v3158_v9 = vpop.f32.mrb[93].mxu1 }
 0x31e   :  { %v3159_v34 = vadd.f32 %v3158_v9, %v3157_v61  ;;  %v3160_v23 = vpop.f32.mrb[94].mxu1  ;;  %v2542_v2 = vpack.c.bf16 %v2513_v58, %v2512_v57  ;;  %v2269_v61 = vadd.f32 %v4466_v39, %v4509_v43 }
 0x31f   :  { %v3161_v4 = vpop.f32.mrb[95].mxu1 }
 0x320   :  { %v2406_v7 = vadd.f32 %v3159_v34, %v2245_v8  ;;  %v3162_v11 = vadd.f32 %v3161_v4, %v3160_v23  ;;  %3279 = vmatprep.mubr.bf16.mxu0 %v2542_v2  ;;  %v2272_v23 = vadd.f32 %v4468_v49, %v4509_v43 }
 0x322   :  { %v2409_v12 = vadd.f32 %v3162_v11, %v2248_v3  ;;  %v2514_v14 = vmax.f32 %v2406_v7, 0.0 }
 0x324   :  { %v2515_v22 = vmax.f32 %v2409_v12, 0.0  ;;  %v3163_v24 = vpop.f32.mrb[96].mxu1 }
 0x325   :  { %v3164_v46 = vpop.f32.mrb[97].mxu1 }
 0x326   :  { %v3165_v13 = vadd.f32 %v3164_v46, %v3163_v24  ;;  %v3166_v15 = vpop.f32.mrb[98].mxu1  ;;  %v2543_v32 = vpack.c.bf16 %v2515_v22, %v2514_v14  ;;  %v2277_v14 = vadd.f32 %v4470_v41, %v4509_v43 }
 0x327   :  { %v3167_v10 = vpop.f32.mrb[99].mxu1 }
 0x328   :  { %v2414_v17 = vadd.f32 %v3165_v13, %v2253_v48  ;;  %v3168_v18 = vadd.f32 %v3167_v10, %v3166_v15  ;;  %3280 = vmatmul.mubr.bf16.gmra.mrb[116].mxu0 %v2543_v32  ;;  %v2280_v48 = vadd.f32 %v4472_v55, %v4509_v43 }
 0x32a   :  { %v2417_v38 = vadd.f32 %v3168_v18, %v2256_v16  ;;  %v2516_v20 = vmax.f32 %v2414_v17, 0.0  ;;  %v2285_v18 = vadd.f32 %v4474_v44, %v4509_v43 }
 0x32c   :  { %v2517_v25 = vmax.f32 %v2417_v38, 0.0  ;;  %v3169_v1 = vpop.f32.mrb[100].mxu1 }
 0x32d   :  { %v3170_v28 = vpop.f32.mrb[101].mxu1 }
 0x32e   :  { %v3171_v60 = vadd.f32 %v3170_v28, %v3169_v1  ;;  %v3172_v21 = vpop.f32.mrb[102].mxu1  ;;  %v2544_v50 = vpack.c.bf16 %v2517_v25, %v2516_v20  ;;  %v2288_v1 = vadd.f32 %v4476_v59, %v4509_v43 }
 0x32f   :  { %v3173_v45 = vpop.f32.mrb[103].mxu1 }
 0x330   :  { %v2422_v53 = vadd.f32 %v3171_v60, %v2261_v31  ;;  %v3174_v27 = vadd.f32 %v3173_v45, %v3172_v21  ;;  %3283 = vmatprep.mubr.bf16.mxu0 %v2544_v50 }
 0x332   :  { %v2425_v42 = vadd.f32 %v3174_v27, %v2264_v47  ;;  %v2518_v62 = vmax.f32 %v2422_v53, 0.0  ;;  %v2293_v47 = vadd.f32 %v4478_v6, %v4509_v43 }
 0x334   :  { %v2519_v56 = vmax.f32 %v2425_v42, 0.0  ;;  %v3175_v57 = vpop.f32.mrb[104].mxu1 }
 0x335   :  { %v3176_v58 = vpop.f32.mrb[105].mxu1 }
 0x336   :  { %v3177_v9 = vadd.f32 %v3176_v58, %v3175_v57  ;;  %v3178_v29 = vpop.f32.mrb[106].mxu1  ;;  %v2545_v8 = vpack.c.bf16 %v2519_v56, %v2518_v62  ;;  %v2296_v62 = vadd.f32 %v4480_v36, %v4509_v43 }
 0x337   :  { %v3179_v34 = vpop.f32.mrb[107].mxu1 }
 0x338   :  { %v2430_v2 = vadd.f32 %v3177_v9, %v2269_v61  ;;  %v3180_v33 = vadd.f32 %v3179_v34, %v3178_v29  ;;  %3284 = vmatmul.mubr.bf16.gmra.mrb[120].mxu0 %v2545_v8  ;;  %v2301_v8 = vadd.f32 %v4482_v35, %v4509_v43 }
 0x33a   :  { %v2433_v4 = vadd.f32 %v3180_v33, %v2272_v23  ;;  %v2520_v3 = vmax.f32 %v2430_v2, 0.0  ;;  %v2304_v33 = vadd.f32 %v4484_v40, %v4509_v43 }
 0x33c   :  { %v2521_v7 = vmax.f32 %v2433_v4, 0.0  ;;  %v3181_v11 = vpop.f32.mrb[108].mxu1 }
 0x33d   :  { %v3182_v12 = vpop.f32.mrb[109].mxu1 }
 0x33e   :  { %v3183_v22 = vadd.f32 %v3182_v12, %v3181_v11  ;;  %v3184_v39 = vpop.f32.mrb[110].mxu1  ;;  %v2546_v24 = vpack.c.bf16 %v2521_v7, %v2520_v3 }
 0x33f   :  { %v3185_v46 = vpop.f32.mrb[111].mxu1 }
 0x340   :  { %v2438_v13 = vadd.f32 %v3183_v22, %v2277_v14  ;;  %v3186_v49 = vadd.f32 %v3185_v46, %v3184_v39  ;;  %3287 = vmatprep.mubr.bf16.mxu0 %v2546_v24  ;;  %v2309_v22 = vadd.f32 %v4486_v52, %v4509_v43 }
 0x342   :  { %v2441_v15 = vadd.f32 %v3186_v49, %v2280_v48  ;;  %v2522_v32 = vmax.f32 %v2438_v13, 0.0  ;;  %v2312_v48 = vadd.f32 %v4488_v0, %v4509_v43 }
 0x344   :  { %v2523_v10 = vmax.f32 %v2441_v15, 0.0  ;;  %v3187_v16 = vpop.f32.mrb[112].mxu1 }
 0x345   :  { %v3188_v17 = vpop.f32.mrb[113].mxu1 }
 0x346   :  { %v3189_v38 = vadd.f32 %v3188_v17, %v3187_v16  ;;  %v3190_v41 = vpop.f32.mrb[114].mxu1  ;;  %v2547_v20 = vpack.c.bf16 %v2523_v10, %v2522_v32  ;;  %v2317_v17 = vadd.f32 %v4490_v26, %v4509_v43 }
 0x347   :  { %v3191_v25 = vpop.f32.mrb[115].mxu1 }
 0x348   :  { %v2446_v28 = vadd.f32 %v3189_v38, %v2285_v18  ;;  %v3192_v55 = vadd.f32 %v3191_v25, %v3190_v41  ;;  %3288 = vmatmul.mubr.bf16.gmra.mrb[124].mxu0 %v2547_v20  ;;  %v2320_v20 = vadd.f32 %v4492_v5, %v4509_v43 }
 0x34a   :  { %v2449_v31 = vadd.f32 %v3192_v55, %v2288_v1  ;;  %v2524_v60 = vmax.f32 %v2446_v28, 0.0 }
 0x34c   :  { %v2525_v21 = vmax.f32 %v2449_v31, 0.0  ;;  %v3193_v50 = vpop.f32.mrb[116].mxu1 }
 0x34d   :  { %v3194_v45 = vpop.f32.mrb[117].mxu1 }
 0x34e   :  { %v3195_v53 = vadd.f32 %v3194_v45, %v3193_v50  ;;  %v3196_v44 = vpop.f32.mrb[118].mxu1  ;;  %v2548_v27 = vpack.c.bf16 %v2525_v21, %v2524_v60  ;;  %v2325_v21 = vadd.f32 %v4494_v19, %v4509_v43 }
 0x34f   :  { %v3197_v42 = vpop.f32.mrb[119].mxu1 }
 0x350   :  { %v2454_v56 = vadd.f32 %v3195_v53, %v2293_v47  ;;  %v3198_v59 = vadd.f32 %v3197_v42, %v3196_v44  ;;  %3291 = vmatprep.mubr.bf16.mxu0 %v2548_v27  ;;  %v2328_v53 = vadd.f32 %v4496_v63, %v4509_v43 }
 0x352   :  { %v2457_v57 = vadd.f32 %v3198_v59, %v2296_v62  ;;  %v2526_v58 = vmax.f32 %v2454_v56, 0.0 }
 0x354   :  { %v2527_v61 = vmax.f32 %v2457_v57, 0.0  ;;  %v3199_v9 = vpop.f32.mrb[120].mxu1  ;;  %v2333_v57 = vadd.f32 %v4498_v30, %v4509_v43 }
 0x355   :  { %v3200_v29 = vpop.f32.mrb[121].mxu1 }
 0x356   :  { %v3201_v34 = vadd.f32 %v3200_v29, %v3199_v9  ;;  %v3202_v6 = vpop.f32.mrb[122].mxu1  ;;  %v2549_v23 = vpack.c.bf16 %v2527_v61, %v2526_v58  ;;  %v2336_v29 = vadd.f32 %v4500_v37, %v4509_v43 }
 0x357   :  { %v3203_v2 = vpop.f32.mrb[123].mxu1 }
 0x358   :  { %v2462_v4 = vadd.f32 %v3201_v34, %v2301_v8  ;;  %v3204_v36 = vadd.f32 %v3203_v2, %v3202_v6  ;;  %3292 = vmatmul.mubr.bf16.gmra.mrb[128].mxu0 %v2549_v23 }
 0x35a   :  { %v2465_v3 = vadd.f32 %v3204_v36, %v2304_v33  ;;  %v2528_v7 = vmax.f32 %v2462_v4, 0.0  ;;  %v2341_v4 = vadd.f32 %v4502_v51, %v4509_v43 }
 0x35c   :  { %v2529_v11 = vmax.f32 %v2465_v3, 0.0  ;;  %v3205_v12 = vpop.f32.mrb[124].mxu1 }
 0x35d   :  { %v3206_v14 = vpop.f32.mrb[125].mxu1 }
 0x35e   :  { %v3207_v39 = vadd.f32 %v3206_v14, %v3205_v12  ;;  %v3208_v35 = vpop.f32.mrb[126].mxu1  ;;  %v2550_v24 = vpack.c.bf16 %v2529_v11, %v2528_v7  ;;  %v2344_v11 = vadd.f32 %v4504_v54, %v4509_v43 }
 0x35f   :  { %v3209_v46 = vpop.f32.mrb[127].mxu1 }
 0x360   :  { %v2470_v13 = vadd.f32 %v3207_v39, %v2309_v22  ;;  %v3210_v40 = vadd.f32 %v3209_v46, %v3208_v35  ;;  %3295 = vmatprep.mubr.bf16.mxu0 %v2550_v24  ;;  %v4578_v24 = vld [vmem:[%s4714_s6] ss:$0 sm:$0xff] }
 0x362   :  { %v2473_v49 = vadd.f32 %v3210_v40, %v2312_v48  ;;  %v2530_v15 = vmax.f32 %v2470_v13, 0.0 }
 0x364   :  { %v2531_v32 = vmax.f32 %v2473_v49, 0.0  ;;  %v3211_v10 = vpop.f32.mrb[128].mxu1 }
 0x365   :  { %v3212_v16 = vpop.f32.mrb[129].mxu1 }
 0x366   :  { %v3213_v18 = vadd.f32 %v3212_v16, %v3211_v10  ;;  %v3214_v52 = vpop.f32.mrb[130].mxu1  ;;  %v2551_v38 = vpack.c.bf16 %v2531_v32, %v2530_v15 }
 0x367   :  { %v3215_v41 = vpop.f32.mrb[131].mxu1 }
 0x368   :  { %v2478_v25 = vadd.f32 %v3213_v18, %v2317_v17  ;;  %v3216_v0 = vadd.f32 %v3215_v41, %v3214_v52  ;;  %3296 = vmatmul.mubr.bf16.gmra.mrb[132].mxu0 %v2551_v38 }
 0x36a   :  { %v2481_v1 = vadd.f32 %v3216_v0, %v2320_v20  ;;  %v2532_v28 = vmax.f32 %v2478_v25, 0.0 }
 0x36c   :  { %v2533_v55 = vmax.f32 %v2481_v1, 0.0  ;;  %v3217_v31 = vpop.f32.mrb[132].mxu1 }
 0x36d   :  { %v3218_v60 = vpop.f32.mrb[133].mxu1 }
 0x36e   :  { %v3219_v50 = vadd.f32 %v3218_v60, %v3217_v31  ;;  %v3220_v26 = vpop.f32.mrb[134].mxu1  ;;  %v2552_v45 = vpack.c.bf16 %v2533_v55, %v2532_v28 }
 0x36f   :  { %v3221_v47 = vpop.f32.mrb[135].mxu1 }
 0x370   :  { %v2486_v44 = vadd.f32 %v3219_v50, %v2325_v21  ;;  %v3222_v5 = vadd.f32 %v3221_v47, %v3220_v26  ;;  %3299 = vmatprep.mubr.bf16.mxu0 %v2552_v45 }
 0x372   :  { %v2489_v27 = vadd.f32 %v3222_v5, %v2328_v53  ;;  %v2534_v42 = vmax.f32 %v2486_v44, 0.0 }
 0x374   :  { %v2535_v62 = vmax.f32 %v2489_v27, 0.0  ;;  %v3223_v56 = vpop.f32.mrb[136].mxu1 }
 0x375   :  { %v3224_v59 = vpop.f32.mrb[137].mxu1 }
 0x376   :  { %v3225_v58 = vadd.f32 %v3224_v59, %v3223_v56  ;;  %v3226_v19 = vpop.f32.mrb[138].mxu1  ;;  %v2553_v61 = vpack.c.bf16 %v2535_v62, %v2534_v42 }
 0x377   :  { %v3227_v9 = vpop.f32.mrb[139].mxu1 }
 0x378   :  { %v2494_v8 = vadd.f32 %v3225_v58, %v2333_v57  ;;  %v3228_v63 = vadd.f32 %v3227_v9, %v3226_v19  ;;  %3300 = vmatmul.mubr.bf16.gmra.mrb[136].mxu0 %v2553_v61 }
 0x37a   :  { %v2497_v34 = vadd.f32 %v3228_v63, %v2336_v29  ;;  %v2536_v6 = vmax.f32 %v2494_v8, 0.0 }
 0x37c   :  { %v2537_v23 = vmax.f32 %v2497_v34, 0.0  ;;  %v3229_v2 = vpop.f32.mrb[140].mxu1 }
 0x37d   :  { %v3230_v33 = vpop.f32.mrb[141].mxu1 }
 0x37e   :  { %v3231_v36 = vadd.f32 %v3230_v33, %v3229_v2  ;;  %v3232_v30 = vpop.f32.mrb[142].mxu1  ;;  %v2554_v3 = vpack.c.bf16 %v2537_v23, %v2536_v6 }
 0x37f   :  { %v3233_v7 = vpop.f32.mrb[143].mxu1 }
 0x380   :  { %v2502_v12 = vadd.f32 %v3231_v36, %v2341_v4  ;;  %v3234_v37 = vadd.f32 %v3233_v7, %v3232_v30  ;;  %3303 = vmatprep.mubr.bf16.mxu0 %v2554_v3 }
 0x382   :  { %v2505_v14 = vadd.f32 %v3234_v37, %v2344_v11  ;;  %v2538_v22 = vmax.f32 %v2502_v12, 0.0 }
 0x384   :  { %v2539_v39 = vmax.f32 %v2505_v14, 0.0 }
 0x386   :  { %v2555_v35 = vpack.c.bf16 %v2539_v39, %v2538_v22 }
 0x388   :  { %3304 = vmatmul.mubr.bf16.gmra.mrb[140].mxu0 %v2555_v35 }
 0x3eb   :  { %v3277_v51 = vpop.f32.mrb[112].mxu0 }
 0x3ec   :  { %v2670_v46 = vadd.f32 %v3277_v51, %v4578_v24  ;;  %v2661_v48 = vpop.f32.mrb[113].mxu0 }
 0x3ed   :  { %v2662_v13 = vadd.f32 %v4578_v24, %v2661_v48  ;;  %v3278_v54 = vpop.f32.mrb[114].mxu0 }
 0x3ee   :  { %2790 = vst [vmem:[%s4715_s7 + $0x10] sm:$0xff] %v2670_v46  ;;  %v2673_v43 = vadd.f32 %v3278_v54, %v4578_v24  ;;  %v2664_v40 = vpop.f32.mrb[115].mxu0 }
 0x3ef   :  { %2788 = vst [vmem:[%s4715_s7] sm:$0xff] %v2662_v13  ;;  %v2665_v49 = vadd.f32 %v4578_v24, %v2664_v40 }
 0x3f0   :  { %2791 = vst [vmem:[%s4715_s7 + $0x18] sm:$0xff] %v2673_v43 }
 0x3f1   :  { %2789 = vst [vmem:[%s4715_s7 + $0x8] sm:$0xff] %v2665_v49 }
 0x3fb   :  { %v3281_v15 = vpop.f32.mrb[116].mxu0 }
 0x3fc   :  { %v2686_v32 = vadd.f32 %v3281_v15, %v4578_v24  ;;  %v2677_v10 = vpop.f32.mrb[117].mxu0 }
 0x3fd   :  { %v2678_v16 = vadd.f32 %v4578_v24, %v2677_v10  ;;  %v3282_v17 = vpop.f32.mrb[118].mxu0 }
 0x3fe   :  { %2794 = vst [vmem:[%s4715_s7 + $0x30] sm:$0xff] %v2686_v32  ;;  %v2689_v18 = vadd.f32 %v3282_v17, %v4578_v24  ;;  %v2680_v52 = vpop.f32.mrb[119].mxu0 }
 0x3ff   :  { %2792 = vst [vmem:[%s4715_s7 + $0x20] sm:$0xff] %v2678_v16  ;;  %v2681_v38 = vadd.f32 %v4578_v24, %v2680_v52 }
 0x400   :  { %2795 = vst [vmem:[%s4715_s7 + $0x38] sm:$0xff] %v2689_v18 }
 0x401   :  { %2793 = vst [vmem:[%s4715_s7 + $0x28] sm:$0xff] %v2681_v38 }
 0x40b   :  { %v3285_v41 = vpop.f32.mrb[120].mxu0 }
 0x40c   :  { %v2702_v20 = vadd.f32 %v3285_v41, %v4578_v24  ;;  %v2693_v25 = vpop.f32.mrb[121].mxu0 }
 0x40d   :  { %v2694_v0 = vadd.f32 %v4578_v24, %v2693_v25  ;;  %v3286_v1 = vpop.f32.mrb[122].mxu0 }
 0x40e   :  { %2798 = vst [vmem:[%s4715_s7 + $0x50] sm:$0xff] %v2702_v20  ;;  %v2705_v28 = vadd.f32 %v3286_v1, %v4578_v24  ;;  %v2696_v55 = vpop.f32.mrb[123].mxu0 }
 0x40f   :  { %2796 = vst [vmem:[%s4715_s7 + $0x40] sm:$0xff] %v2694_v0  ;;  %v2697_v31 = vadd.f32 %v4578_v24, %v2696_v55 }
 0x410   :  { %2799 = vst [vmem:[%s4715_s7 + $0x58] sm:$0xff] %v2705_v28 }
 0x411   :  { %2797 = vst [vmem:[%s4715_s7 + $0x48] sm:$0xff] %v2697_v31 }
 0x41b   :  { %v3289_v60 = vpop.f32.mrb[124].mxu0 }
 0x41c   :  { %v2718_v21 = vadd.f32 %v3289_v60, %v4578_v24  ;;  %v2709_v50 = vpop.f32.mrb[125].mxu0 }
 0x41d   :  { %v2710_v26 = vadd.f32 %v4578_v24, %v2709_v50  ;;  %v3290_v45 = vpop.f32.mrb[126].mxu0 }
 0x41e   :  { %2802 = vst [vmem:[%s4715_s7 + $0x70] sm:$0xff] %v2718_v21  ;;  %v2721_v47 = vadd.f32 %v3290_v45, %v4578_v24  ;;  %v2712_v53 = vpop.f32.mrb[127].mxu0 }
 0x41f   :  { %2800 = vst [vmem:[%s4715_s7 + $0x60] sm:$0xff] %v2710_v26  ;;  %v2713_v44 = vadd.f32 %v4578_v24, %v2712_v53 }
 0x420   :  { %2803 = vst [vmem:[%s4715_s7 + $0x78] sm:$0xff] %v2721_v47 }
 0x421   :  { %2801 = vst [vmem:[%s4715_s7 + $0x68] sm:$0xff] %v2713_v44 }
 0x42b   :  { %v3293_v5 = vpop.f32.mrb[128].mxu0 }
 0x42c   :  { %v2734_v27 = vadd.f32 %v3293_v5, %v4578_v24  ;;  %v2725_v42 = vpop.f32.mrb[129].mxu0 }
 0x42d   :  { %v2726_v62 = vadd.f32 %v4578_v24, %v2725_v42  ;;  %v3294_v56 = vpop.f32.mrb[130].mxu0 }
 0x42e   :  { %2806 = vst [vmem:[%s4715_s7 + $0x90] sm:$0xff] %v2734_v27  ;;  %v2737_v59 = vadd.f32 %v3294_v56, %v4578_v24  ;;  %v2728_v57 = vpop.f32.mrb[131].mxu0 }
 0x42f   :  { %2804 = vst [vmem:[%s4715_s7 + $0x80] sm:$0xff] %v2726_v62  ;;  %v2729_v58 = vadd.f32 %v4578_v24, %v2728_v57 }
 0x430   :  { %2807 = vst [vmem:[%s4715_s7 + $0x98] sm:$0xff] %v2737_v59 }
 0x431   :  { %2805 = vst [vmem:[%s4715_s7 + $0x88] sm:$0xff] %v2729_v58 }
 0x43b   :  { %v3297_v19 = vpop.f32.mrb[132].mxu0 }
 0x43c   :  { %v2750_v61 = vadd.f32 %v3297_v19, %v4578_v24  ;;  %v2741_v9 = vpop.f32.mrb[133].mxu0 }
 0x43d   :  { %v2742_v29 = vadd.f32 %v4578_v24, %v2741_v9  ;;  %v3298_v8 = vpop.f32.mrb[134].mxu0 }
 0x43e   :  { %2810 = vst [vmem:[%s4715_s7 + $0xb0] sm:$0xff] %v2750_v61  ;;  %v2753_v63 = vadd.f32 %v3298_v8, %v4578_v24  ;;  %v2744_v34 = vpop.f32.mrb[135].mxu0 }
 0x43f   :  { %2808 = vst [vmem:[%s4715_s7 + $0xa0] sm:$0xff] %v2742_v29  ;;  %v2745_v6 = vadd.f32 %v4578_v24, %v2744_v34 }
 0x440   :  { %2811 = vst [vmem:[%s4715_s7 + $0xb8] sm:$0xff] %v2753_v63 }
 0x441   :  { %2809 = vst [vmem:[%s4715_s7 + $0xa8] sm:$0xff] %v2745_v6 }
 0x44b   :  { %v3301_v23 = vpop.f32.mrb[136].mxu0 }
 0x44c   :  { %v2766_v2 = vadd.f32 %v3301_v23, %v4578_v24  ;;  %v2757_v33 = vpop.f32.mrb[137].mxu0 }
 0x44d   :  { %v2758_v4 = vadd.f32 %v4578_v24, %v2757_v33  ;;  %v3302_v36 = vpop.f32.mrb[138].mxu0 }
 0x44e   :  { %2814 = vst [vmem:[%s4715_s7 + $0xd0] sm:$0xff] %v2766_v2  ;;  %v2769_v30 = vadd.f32 %v3302_v36, %v4578_v24  ;;  %v2760_v3 = vpop.f32.mrb[139].mxu0 }
 0x44f   :  { %2812 = vst [vmem:[%s4715_s7 + $0xc0] sm:$0xff] %v2758_v4  ;;  %v2761_v7 = vadd.f32 %v4578_v24, %v2760_v3 }
 0x450   :  { %2815 = vst [vmem:[%s4715_s7 + $0xd8] sm:$0xff] %v2769_v30 }
 0x451   :  { %2813 = vst [vmem:[%s4715_s7 + $0xc8] sm:$0xff] %v2761_v7 }
 0x45b   :  { %v3305_v11 = vpop.f32.mrb[140].mxu0 }
 0x45c   :  { %v2782_v12 = vadd.f32 %v3305_v11, %v4578_v24  ;;  %v2773_v37 = vpop.f32.mrb[141].mxu0 }
 0x45d   :  { %v2774_v14 = vadd.f32 %v4578_v24, %v2773_v37  ;;  %v3306_v22 = vpop.f32.mrb[142].mxu0 }
 0x45e   :  { %2818 = vst [vmem:[%s4715_s7 + $0xf0] sm:$0xff] %v2782_v12  ;;  %v2785_v39 = vadd.f32 %v3306_v22, %v4578_v24  ;;  %v2776_v35 = vpop.f32.mrb[143].mxu0 }
 0x45f   :  { %2816 = vst [vmem:[%s4715_s7 + $0xe0] sm:$0xff] %v2774_v14  ;;  %v2777_v51 = vadd.f32 %v4578_v24, %v2776_v35 }
 0x460   :  { %2819 = vst [vmem:[%s4715_s7 + $0xf8] sm:$0xff] %v2785_v39 }
 0x461   :  { %2817 = vst [vmem:[%s4715_s7 + $0xe8] sm:$0xff] %v2777_v51 }
 0x462   :  { %2824 = vsyncpa [#allocation3], 1 }

</bundles_post_ra>
